<compile_context>
chip_gen: v5e
topology: v5e:2x2
jax: 0.10.0
libtpu: 0.0.40
codegen_flags: <defaults>
</compile_context>

<pallas_src>
import functools

import jax
import jax.numpy as jnp
from jax import lax
from jax.experimental import pallas as pl
from jax.experimental.pallas import tpu as pltpu


def _reorder_gates(w):
    """Reorder PyTorch gate columns [i, f, g, o] -> [i, f, o, g] along last axis."""
    i, f, g, o = jnp.split(w, 4, axis=-1)
    return jnp.concatenate([i, f, o, g], axis=-1)


def _gate_math(gates, h_dim, c_prev):
    """gates columns ordered [i, f, o | g]; returns (h_new, c_new). f32 math."""
    sig = jax.nn.sigmoid(gates[:, : 3 * h_dim])
    g_g = jnp.tanh(gates[:, 3 * h_dim:])
    i_g = sig[:, :h_dim]
    f_g = sig[:, h_dim: 2 * h_dim]
    o_g = sig[:, 2 * h_dim: 3 * h_dim]
    c_new = f_g * c_prev + i_g * g_g
    h_new = o_g * jnp.tanh(c_new)
    return h_new, c_new


def _lstm_decoder_kernel(n_layers, t_blk, h_dim,
                         xproj_ref, h0_ref, c0_ref, whh0_ref, *rest):
    n_extra = 2 * (n_layers - 1)
    layer_refs = rest[:n_extra]  # (w_cat_l, b_l) for l = 1..L-1
    hs_ref, hN_ref, cN_ref, h_s, c_s = rest[n_extra:]

    tb = pl.program_id(0)

    @pl.when(tb == 0)
    def _():
        h_s[...] = h0_ref[...].astype(jnp.float32)
        c_s[...] = c0_ref[...].astype(jnp.float32)

    # Hoist weight reads out of the time loop (grid-resident, already f32).
    w_hh0 = whh0_ref[...]
    w_cats = [layer_refs[2 * (l - 1)][...] for l in range(1, n_layers)]
    biases = [layer_refs[2 * (l - 1) + 1][...] for l in range(1, n_layers)]

    def step(s):
        # Layer 0: input projection (incl. bias) precomputed outside; only the
        # recurrent matmul remains in the kernel.
        gates = xproj_ref[s] + jnp.dot(
            h_s[0], w_hh0, preferred_element_type=jnp.float32)
        h_new, c_new = _gate_math(gates, h_dim, c_s[0])
        h_s[0] = h_new
        c_s[0] = c_new
        inp = h_new
        # TODO(synk): inter-layer dropout (p=0.2) is a train-time op; eval semantics here.
        for l in range(1, n_layers):
            zc = jnp.concatenate([inp, h_s[l]], axis=-1)  # (B, 2H)
            gates = jnp.dot(
                zc, w_cats[l - 1], preferred_element_type=jnp.float32) + biases[l - 1]
            h_new, c_new = _gate_math(gates, h_dim, c_s[l])
            h_s[l] = h_new
            c_s[l] = c_new
            inp = h_new
        hs_ref[s] = inp  # lane-dense (B, H) slab for this step

    def body(s, carry):
        step(s)
        return carry

    unroll = t_blk if t_blk <= 8 else 4
    lax.fori_loop(0, t_blk, body, 0, unroll=unroll)

    @pl.when(tb == pl.num_programs(0) - 1)
    def _():
        hN_ref[...] = h_s[...].astype(hN_ref.dtype)
        cN_ref[...] = c_s[...].astype(cN_ref.dtype)


def lstm_decoder_forward(x, h0, c0, params, n_layers, t_block=16):
    B, T, D_in = x.shape
    L, _, H = h0.shape
    assert L == n_layers
    O = params["w_fc"].shape[1]

    # Pick a time block that divides T (no tail handling needed).
    t_blk = min(t_block, T)
    while T % t_blk != 0:
        t_blk -= 1
    n_blocks = T // t_blk

    f32 = jnp.float32
    # --- one-time weight prep in XLA (hoisted out of the kernel) ---
    w_ih0 = _reorder_gates(params["w_ih_0"].astype(f32))
    b0 = _reorder_gates(params["b_0"].astype(f32))
    # Layer-0 input projection for ALL timesteps, laid out (T, B, 4H) so the kernel
    # can index the leading (time) axis dynamically.
    x_proj = jnp.einsum("btd,dg->tbg", x.astype(f32), w_ih0) + b0
    w_hh0 = _reorder_gates(params["w_hh_0"].astype(f32))

    args = [x_proj, h0, c0, w_hh0]
    in_specs = [
        pl.BlockSpec((t_blk, B, 4 * H), lambda t: (t, 0, 0)),
        pl.BlockSpec((L, B, H), lambda t: (0, 0, 0)),
        pl.BlockSpec((L, B, H), lambda t: (0, 0, 0)),
        pl.BlockSpec((H, 4 * H), lambda t: (0, 0)),
    ]
    for l in range(1, n_layers):
        w_cat = jnp.concatenate(
            [_reorder_gates(params[f"w_ih_{l}"].astype(f32)),
             _reorder_gates(params[f"w_hh_{l}"].astype(f32))], axis=0)  # (2H, 4H)
        b_l = _reorder_gates(params[f"b_{l}"].astype(f32))              # (1, 4H)
        args += [w_cat, b_l]
        in_specs += [
            pl.BlockSpec((2 * H, 4 * H), lambda t: (0, 0)),
            pl.BlockSpec((1, 4 * H), lambda t: (0, 0)),
        ]

    out_shape = (
        jax.ShapeDtypeStruct((T, B, H), f32),       # top-layer hidden states
        jax.ShapeDtypeStruct((L, B, H), h0.dtype),  # final hidden
        jax.ShapeDtypeStruct((L, B, H), c0.dtype),  # final cell
    )
    out_specs = (
        pl.BlockSpec((t_blk, B, H), lambda t: (t, 0, 0)),
        pl.BlockSpec((L, B, H), lambda t: (0, 0, 0)),
        pl.BlockSpec((L, B, H), lambda t: (0, 0, 0)),
    )

    kernel = functools.partial(_lstm_decoder_kernel, n_layers, t_blk, H)
    hs, hN, cN = pl.pallas_call(
        kernel,
        out_shape=out_shape,
        grid_spec=pltpu.PrefetchScalarGridSpec(
            num_scalar_prefetch=0,
            grid=(n_blocks,),
            in_specs=in_specs,
            out_specs=out_specs,
            scratch_shapes=[
                pltpu.VMEM((L, B, H), jnp.float32),
                pltpu.VMEM((L, B, H), jnp.float32),
            ],
        ),
        compiler_params=pltpu.CompilerParams(
            dimension_semantics=("arbitrary",),  # time recurrence is sequential
        ),
    )(*args)

    # Final Linear projection: one big lane-dense matmul in XLA (O=7 << 128 lanes,
    # so doing it per-step inside the kernel would force masked partial stores).
    y = jnp.einsum("tbh,ho->bto", hs, params["w_fc"].astype(f32)) \
        + params["b_fc"].astype(f32)
    return y.astype(x.dtype), hN, cN


def lstm_decoder_reference(x, h0, c0, params, n_layers):
    """Pure-JAX reference matching PyTorch nn.LSTM (eval) + nn.Linear."""
    B, T, D_in = x.shape
    L, _, H = h0.shape
    h = [h0[l] for l in range(L)]
    c = [c0[l] for l in range(L)]
    ys = []
    for t in range(T):
        inp = x[:, t, :]
        for l in range(L):
            gates = inp @ params[f"w_ih_{l}"] + h[l] @ params[f"w_hh_{l}"] + params[f"b_{l}"]
            i_g = jax.nn.sigmoid(gates[:, 0:H])
            f_g = jax.nn.sigmoid(gates[:, H:2 * H])
            g_g = jnp.tanh(gates[:, 2 * H:3 * H])
            o_g = jax.nn.sigmoid(gates[:, 3 * H:4 * H])
            c[l] = f_g * c[l] + i_g * g_g
            h[l] = o_g * jnp.tanh(c[l])
            inp = h[l]
        ys.append(inp @ params["w_fc"] + params["b_fc"])
    y = jnp.stack(ys, axis=1)
    return y, jnp.stack(h, axis=0), jnp.stack(c, axis=0)


def init_params(key, input_dim, hidden_dim, output_dim, n_layers):
    """Deterministic synthetic init (uniform(-1/sqrt(H), 1/sqrt(H)) like PyTorch)."""
    params = {}
    bound = 1.0 / jnp.sqrt(jnp.float32(hidden_dim))
    for l in range(n_layers):
        d_in = input_dim if l == 0 else hidden_dim
        key, k1, k2, k3, k4 = jax.random.split(key, 5)
        # Stored pre-transposed as (in, 4H), PyTorch gate column order [i, f, g, o].
        params[f"w_ih_{l}"] = jax.random.uniform(
            k1, (d_in, 4 * hidden_dim), jnp.float32, -bound, bound)
        params[f"w_hh_{l}"] = jax.random.uniform(
            k2, (hidden_dim, 4 * hidden_dim), jnp.float32, -bound, bound)
        b_ih = jax.random.uniform(k3, (4 * hidden_dim,), jnp.float32, -bound, bound)
        b_hh = jax.random.uniform(k4, (4 * hidden_dim,), jnp.float32, -bound, bound)
        params[f"b_{l}"] = (b_ih + b_hh).reshape(1, 4 * hidden_dim)
    key, k1, k2 = jax.random.split(key, 3)
    fc_bound = 1.0 / jnp.sqrt(jnp.float32(hidden_dim))
    params["w_fc"] = jax.random.uniform(
        k1, (hidden_dim, output_dim), jnp.float32, -fc_bound, fc_bound)
    params["b_fc"] = jax.random.uniform(
        k2, (1, output_dim), jnp.float32, -fc_bound, fc_bound)
    return params


if __name__ == "__main__":
    # Small shapes consistent with the module defaults (input_dim=1, output_dim=7,
    # n_layers=2), scaled-down hidden for a quick run.
    batch, seq_len = 2, 8
    input_dim, hidden_dim, output_dim, n_layers = 1, 32, 7, 2

    key = jax.random.PRNGKey(0)
    key, kx, kh, kc, kp = jax.random.split(key, 5)
    x_t = jax.random.normal(kx, (batch, seq_len, input_dim), jnp.float32)
    hidden = jax.random.normal(kh, (n_layers, batch, hidden_dim), jnp.float32)
    cell = jax.random.normal(kc, (n_layers, batch, hidden_dim), jnp.float32)
    params = init_params(kp, input_dim, hidden_dim, output_dim, n_layers)

    y, h_out, c_out = lstm_decoder_forward(x_t, hidden, cell, params, n_layers)
    jax.block_until_ready((y, h_out, c_out))

    y_ref, h_ref, c_ref = lstm_decoder_reference(x_t, hidden, cell, params, n_layers)
    assert y.shape == (batch, seq_len, output_dim)
    assert h_out.shape == (n_layers, batch, hidden_dim)
    assert c_out.shape == (n_layers, batch, hidden_dim)
    assert jnp.allclose(y, y_ref, rtol=1e-4, atol=1e-4)
    assert jnp.allclose(h_out, h_ref, rtol=1e-4, atol=1e-4)
    assert jnp.allclose(c_out, c_ref, rtol=1e-4, atol=1e-4)

    print("KERNEL_OK")
</pallas_src>

<mosaic_0001>
module attributes {stable_mosaic.version = 11 : i64} {
  func.func @_lstm_decoder_kernel(%arg0: i32, %arg1: memref<8x2x128xf32, #tpu.memory_space<vmem>>, %arg2: memref<2x2x32xf32, #tpu.memory_space<vmem>>, %arg3: memref<2x2x32xf32, #tpu.memory_space<vmem>>, %arg4: memref<32x128xf32, #tpu.memory_space<vmem>>, %arg5: memref<64x128xf32, #tpu.memory_space<vmem>>, %arg6: memref<1x128xf32, #tpu.memory_space<vmem>>, %arg7: memref<8x2x32xf32, #tpu.memory_space<vmem>>, %arg8: memref<2x2x32xf32, #tpu.memory_space<vmem>>, %arg9: memref<2x2x32xf32, #tpu.memory_space<vmem>>, %arg10: memref<2x2x32xf32, #tpu.memory_space<vmem>>, %arg11: memref<2x2x32xf32, #tpu.memory_space<vmem>>) attributes {dimension_semantics = [#tpu.dimension_semantics<arbitrary>], iteration_bounds = array<i64: 1>, scalar_prefetch = 0 : i64, scratch_operands = 2 : i64, tpu.core_type = #tpu.core_type<tc>, window_params = [{transform_indices = @transform_0, window_bounds = array<i64: 8, 2, 128>}, {pipeline_mode = #tpu.pipeline_mode<synchronous>, transform_indices = @transform_1, window_bounds = array<i64: 2, 2, 32>}, {pipeline_mode = #tpu.pipeline_mode<synchronous>, transform_indices = @transform_2, window_bounds = array<i64: 2, 2, 32>}, {pipeline_mode = #tpu.pipeline_mode<synchronous>, transform_indices = @transform_3, window_bounds = array<i64: 32, 128>}, {pipeline_mode = #tpu.pipeline_mode<synchronous>, transform_indices = @transform_4, window_bounds = array<i64: 64, 128>}, {pipeline_mode = #tpu.pipeline_mode<synchronous>, transform_indices = @transform_5, window_bounds = array<i64: 1, 128>}, {transform_indices = @transform_6, window_bounds = array<i64: 8, 2, 32>}, {pipeline_mode = #tpu.pipeline_mode<synchronous>, transform_indices = @transform_7, window_bounds = array<i64: 2, 2, 32>}, {pipeline_mode = #tpu.pipeline_mode<synchronous>, transform_indices = @transform_8, window_bounds = array<i64: 2, 2, 32>}]} {
    %c0_i32 = arith.constant 0 : i32
    %0 = arith.cmpi eq, %arg0, %c0_i32 : i32
    %1 = arith.extui %0 : i1 to i32
    %c0_i32_0 = arith.constant 0 : i32
    %2 = arith.cmpi ne, %1, %c0_i32_0 : i32
    scf.if %2 {
      %c0_263 = arith.constant 0 : index
      %c0_264 = arith.constant 0 : index
      %c0_265 = arith.constant 0 : index
      %529 = vector.load %arg2[%c0_263, %c0_264, %c0_265] : memref<2x2x32xf32, #tpu.memory_space<vmem>>, vector<2x2x32xf32>
      %c0_266 = arith.constant 0 : index
      %c0_267 = arith.constant 0 : index
      %c0_268 = arith.constant 0 : index
      %530 = vector.load %arg10[%c0_266, %c0_267, %c0_268] : memref<2x2x32xf32, #tpu.memory_space<vmem>>, vector<2x2x32xf32>
      tpu.vector_store %arg10[%c0_266, %c0_267, %c0_268], %529 {strides = array<i32>} : memref<2x2x32xf32, #tpu.memory_space<vmem>>, vector<2x2x32xf32>,
      %c0_269 = arith.constant 0 : index
      %c0_270 = arith.constant 0 : index
      %c0_271 = arith.constant 0 : index
      %531 = vector.load %arg3[%c0_269, %c0_270, %c0_271] : memref<2x2x32xf32, #tpu.memory_space<vmem>>, vector<2x2x32xf32>
      %c0_272 = arith.constant 0 : index
      %c0_273 = arith.constant 0 : index
      %c0_274 = arith.constant 0 : index
      %532 = vector.load %arg11[%c0_272, %c0_273, %c0_274] : memref<2x2x32xf32, #tpu.memory_space<vmem>>, vector<2x2x32xf32>
      tpu.vector_store %arg11[%c0_272, %c0_273, %c0_274], %531 {strides = array<i32>} : memref<2x2x32xf32, #tpu.memory_space<vmem>>, vector<2x2x32xf32>,
    } else {
    }
    %c0 = arith.constant 0 : index
    %c0_1 = arith.constant 0 : index
    %3 = vector.load %arg4[%c0, %c0_1] : memref<32x128xf32, #tpu.memory_space<vmem>>, vector<32x128xf32>
    %c0_2 = arith.constant 0 : index
    %c0_3 = arith.constant 0 : index
    %4 = vector.load %arg5[%c0_2, %c0_3] : memref<64x128xf32, #tpu.memory_space<vmem>>, vector<64x128xf32>
    %c0_4 = arith.constant 0 : index
    %c0_5 = arith.constant 0 : index
    %5 = vector.load %arg6[%c0_4, %c0_5] : memref<1x128xf32, #tpu.memory_space<vmem>>, vector<1x128xf32>
    %c0_i32_6 = arith.constant 0 : i32
    %6 = arith.index_cast %c0_i32_6 : i32 to index
    %c0_7 = arith.constant 0 : index
    %c0_8 = arith.constant 0 : index
    %7 = vector.load %arg1[%6, %c0_7, %c0_8] : memref<8x2x128xf32, #tpu.memory_space<vmem>>, vector<1x2x128xf32>
    %8 = vector.shape_cast %7 : vector<1x2x128xf32> to vector<2x128xf32>
    %c0_9 = arith.constant 0 : index
    %c0_10 = arith.constant 0 : index
    %c0_11 = arith.constant 0 : index
    %9 = vector.load %arg10[%c0_9, %c0_10, %c0_11] : memref<2x2x32xf32, #tpu.memory_space<vmem>>, vector<1x2x32xf32>
    %10 = vector.shape_cast %9 : vector<1x2x32xf32> to vector<2x32xf32>
    %cst = arith.constant dense<0.000000e+00> : vector<2x128xf32>
    %11 = tpu.matmul %10, %3, %cst {dimension_numbers = #tpu.dot_dimension_numbers<[1], [0], [0], [1], [0, 0, 1, 1], [], []>} : vector<2x32xf32>, vector<32x128xf32>, vector<2x128xf32> -> vector<2x128xf32>
    %12 = arith.addf %8, %11 : vector<2x128xf32>
    %c0_12 = arith.constant 0 : index
    %c0_13 = arith.constant 0 : index
    %c0_14 = arith.constant 0 : index
    %13 = vector.load %arg11[%c0_12, %c0_13, %c0_14] : memref<2x2x32xf32, #tpu.memory_space<vmem>>, vector<1x2x32xf32>
    %14 = vector.shape_cast %13 : vector<1x2x32xf32> to vector<2x32xf32>
    %15 = vector.extract_strided_slice %12 {offsets = [0, 0], sizes = [2, 96], strides = [1, 1]} : vector<2x128xf32> to vector<2x96xf32>
    %16 = arith.negf %15 : vector<2x96xf32>
    %17 = math.exp %16 : vector<2x96xf32>
    %cst_15 = arith.constant 1.000000e+00 : f32
    %18 = vector.broadcast %cst_15 : f32 to vector<2x96xf32>
    %19 = arith.addf %18, %17 : vector<2x96xf32>
    %20 = arith.divf %18, %19 : vector<2x96xf32>
    %21 = vector.extract_strided_slice %12 {offsets = [0, 96], sizes = [2, 32], strides = [1, 1]} : vector<2x128xf32> to vector<2x32xf32>
    %22 = math.tanh %21 : vector<2x32xf32>
    %23 = vector.extract_strided_slice %20 {offsets = [0, 0], sizes = [2, 32], strides = [1, 1]} : vector<2x96xf32> to vector<2x32xf32>
    %24 = vector.extract_strided_slice %20 {offsets = [0, 32], sizes = [2, 32], strides = [1, 1]} : vector<2x96xf32> to vector<2x32xf32>
    %25 = vector.extract_strided_slice %20 {offsets = [0, 64], sizes = [2, 32], strides = [1, 1]} : vector<2x96xf32> to vector<2x32xf32>
    %26 = arith.mulf %24, %14 : vector<2x32xf32>
    %27 = arith.mulf %23, %22 : vector<2x32xf32>
    %28 = arith.addf %26, %27 : vector<2x32xf32>
    %29 = math.tanh %28 : vector<2x32xf32>
    %30 = arith.mulf %25, %29 : vector<2x32xf32>
    %c0_16 = arith.constant 0 : index
    %c0_17 = arith.constant 0 : index
    %c0_18 = arith.constant 0 : index
    %31 = vector.load %arg10[%c0_16, %c0_17, %c0_18] : memref<2x2x32xf32, #tpu.memory_space<vmem>>, vector<1x2x32xf32>
    %32 = vector.shape_cast %31 : vector<1x2x32xf32> to vector<2x32xf32>
    %33 = vector.shape_cast %30 : vector<2x32xf32> to vector<1x2x32xf32>
    tpu.vector_store %arg10[%c0_16, %c0_17, %c0_18], %33 {strides = array<i32>} : memref<2x2x32xf32, #tpu.memory_space<vmem>>, vector<1x2x32xf32>,
    %c0_19 = arith.constant 0 : index
    %c0_20 = arith.constant 0 : index
    %c0_21 = arith.constant 0 : index
    %34 = vector.load %arg11[%c0_19, %c0_20, %c0_21] : memref<2x2x32xf32, #tpu.memory_space<vmem>>, vector<1x2x32xf32>
    %35 = vector.shape_cast %34 : vector<1x2x32xf32> to vector<2x32xf32>
    %36 = vector.shape_cast %28 : vector<2x32xf32> to vector<1x2x32xf32>
    tpu.vector_store %arg11[%c0_19, %c0_20, %c0_21], %36 {strides = array<i32>} : memref<2x2x32xf32, #tpu.memory_space<vmem>>, vector<1x2x32xf32>,
    %c1 = arith.constant 1 : index
    %c0_22 = arith.constant 0 : index
    %c0_23 = arith.constant 0 : index
    %37 = vector.load %arg10[%c1, %c0_22, %c0_23] : memref<2x2x32xf32, #tpu.memory_space<vmem>>, vector<1x2x32xf32>
    %38 = vector.shape_cast %37 : vector<1x2x32xf32> to vector<2x32xf32>
    %39 = tpu.concatenate %30, %38 in 1 : vector<2x32xf32>, vector<2x32xf32> -> vector<2x64xf32>
    %cst_24 = arith.constant dense<0.000000e+00> : vector<2x128xf32>
    %40 = tpu.matmul %39, %4, %cst_24 {dimension_numbers = #tpu.dot_dimension_numbers<[1], [0], [0], [1], [0, 0, 1, 1], [], []>} : vector<2x64xf32>, vector<64x128xf32>, vector<2x128xf32> -> vector<2x128xf32>
    %41 = vector.broadcast %5 : vector<1x128xf32> to vector<2x128xf32>
    %42 = arith.addf %40, %41 : vector<2x128xf32>
    %c1_25 = arith.constant 1 : index
    %c0_26 = arith.constant 0 : index
    %c0_27 = arith.constant 0 : index
    %43 = vector.load %arg11[%c1_25, %c0_26, %c0_27] : memref<2x2x32xf32, #tpu.memory_space<vmem>>, vector<1x2x32xf32>
    %44 = vector.shape_cast %43 : vector<1x2x32xf32> to vector<2x32xf32>
    %45 = vector.extract_strided_slice %42 {offsets = [0, 0], sizes = [2, 96], strides = [1, 1]} : vector<2x128xf32> to vector<2x96xf32>
    %46 = arith.negf %45 : vector<2x96xf32>
    %47 = math.exp %46 : vector<2x96xf32>
    %cst_28 = arith.constant 1.000000e+00 : f32
    %48 = vector.broadcast %cst_28 : f32 to vector<2x96xf32>
    %49 = arith.addf %48, %47 : vector<2x96xf32>
    %50 = arith.divf %48, %49 : vector<2x96xf32>
    %51 = vector.extract_strided_slice %42 {offsets = [0, 96], sizes = [2, 32], strides = [1, 1]} : vector<2x128xf32> to vector<2x32xf32>
    %52 = math.tanh %51 : vector<2x32xf32>
    %53 = vector.extract_strided_slice %50 {offsets = [0, 0], sizes = [2, 32], strides = [1, 1]} : vector<2x96xf32> to vector<2x32xf32>
    %54 = vector.extract_strided_slice %50 {offsets = [0, 32], sizes = [2, 32], strides = [1, 1]} : vector<2x96xf32> to vector<2x32xf32>
    %55 = vector.extract_strided_slice %50 {offsets = [0, 64], sizes = [2, 32], strides = [1, 1]} : vector<2x96xf32> to vector<2x32xf32>
    %56 = arith.mulf %54, %44 : vector<2x32xf32>
    %57 = arith.mulf %53, %52 : vector<2x32xf32>
    %58 = arith.addf %56, %57 : vector<2x32xf32>
    %59 = math.tanh %58 : vector<2x32xf32>
    %60 = arith.mulf %55, %59 : vector<2x32xf32>
    %c1_29 = arith.constant 1 : index
    %c0_30 = arith.constant 0 : index
    %c0_31 = arith.constant 0 : index
    %61 = vector.load %arg10[%c1_29, %c0_30, %c0_31] : memref<2x2x32xf32, #tpu.memory_space<vmem>>, vector<1x2x32xf32>
    %62 = vector.shape_cast %61 : vector<1x2x32xf32> to vector<2x32xf32>
    %63 = vector.shape_cast %60 : vector<2x32xf32> to vector<1x2x32xf32>
    tpu.vector_store %arg10[%c1_29, %c0_30, %c0_31], %63 {strides = array<i32>} : memref<2x2x32xf32, #tpu.memory_space<vmem>>, vector<1x2x32xf32>,
    %c1_32 = arith.constant 1 : index
    %c0_33 = arith.constant 0 : index
    %c0_34 = arith.constant 0 : index
    %64 = vector.load %arg11[%c1_32, %c0_33, %c0_34] : memref<2x2x32xf32, #tpu.memory_space<vmem>>, vector<1x2x32xf32>
    %65 = vector.shape_cast %64 : vector<1x2x32xf32> to vector<2x32xf32>
    %66 = vector.shape_cast %58 : vector<2x32xf32> to vector<1x2x32xf32>
    tpu.vector_store %arg11[%c1_32, %c0_33, %c0_34], %66 {strides = array<i32>} : memref<2x2x32xf32, #tpu.memory_space<vmem>>, vector<1x2x32xf32>,
    %67 = arith.index_cast %c0_i32_6 : i32 to index
    %c0_35 = arith.constant 0 : index
    %c0_36 = arith.constant 0 : index
    %68 = vector.load %arg7[%67, %c0_35, %c0_36] : memref<8x2x32xf32, #tpu.memory_space<vmem>>, vector<1x2x32xf32>
    %69 = vector.shape_cast %68 : vector<1x2x32xf32> to vector<2x32xf32>
    %70 = vector.shape_cast %60 : vector<2x32xf32> to vector<1x2x32xf32>
    tpu.vector_store %arg7[%67, %c0_35, %c0_36], %70 {strides = array<i32>} : memref<8x2x32xf32, #tpu.memory_space<vmem>>, vector<1x2x32xf32>,
    %c1_i32 = arith.constant 1 : i32
    %71 = arith.index_cast %c1_i32 : i32 to index
    %c0_37 = arith.constant 0 : index
    %c0_38 = arith.constant 0 : index
    %72 = vector.load %arg1[%71, %c0_37, %c0_38] : memref<8x2x128xf32, #tpu.memory_space<vmem>>, vector<1x2x128xf32>
    %73 = vector.shape_cast %72 : vector<1x2x128xf32> to vector<2x128xf32>
    %c0_39 = arith.constant 0 : index
    %c0_40 = arith.constant 0 : index
    %c0_41 = arith.constant 0 : index
    %74 = vector.load %arg10[%c0_39, %c0_40, %c0_41] : memref<2x2x32xf32, #tpu.memory_space<vmem>>, vector<1x2x32xf32>
    %75 = vector.shape_cast %74 : vector<1x2x32xf32> to vector<2x32xf32>
    %cst_42 = arith.constant dense<0.000000e+00> : vector<2x128xf32>
    %76 = tpu.matmul %75, %3, %cst_42 {dimension_numbers = #tpu.dot_dimension_numbers<[1], [0], [0], [1], [0, 0, 1, 1], [], []>} : vector<2x32xf32>, vector<32x128xf32>, vector<2x128xf32> -> vector<2x128xf32>
    %77 = arith.addf %73, %76 : vector<2x128xf32>
    %c0_43 = arith.constant 0 : index
    %c0_44 = arith.constant 0 : index
    %c0_45 = arith.constant 0 : index
    %78 = vector.load %arg11[%c0_43, %c0_44, %c0_45] : memref<2x2x32xf32, #tpu.memory_space<vmem>>, vector<1x2x32xf32>
    %79 = vector.shape_cast %78 : vector<1x2x32xf32> to vector<2x32xf32>
    %80 = vector.extract_strided_slice %77 {offsets = [0, 0], sizes = [2, 96], strides = [1, 1]} : vector<2x128xf32> to vector<2x96xf32>
    %81 = arith.negf %80 : vector<2x96xf32>
    %82 = math.exp %81 : vector<2x96xf32>
    %cst_46 = arith.constant 1.000000e+00 : f32
    %83 = vector.broadcast %cst_46 : f32 to vector<2x96xf32>
    %84 = arith.addf %83, %82 : vector<2x96xf32>
    %85 = arith.divf %83, %84 : vector<2x96xf32>
    %86 = vector.extract_strided_slice %77 {offsets = [0, 96], sizes = [2, 32], strides = [1, 1]} : vector<2x128xf32> to vector<2x32xf32>
    %87 = math.tanh %86 : vector<2x32xf32>
    %88 = vector.extract_strided_slice %85 {offsets = [0, 0], sizes = [2, 32], strides = [1, 1]} : vector<2x96xf32> to vector<2x32xf32>
    %89 = vector.extract_strided_slice %85 {offsets = [0, 32], sizes = [2, 32], strides = [1, 1]} : vector<2x96xf32> to vector<2x32xf32>
    %90 = vector.extract_strided_slice %85 {offsets = [0, 64], sizes = [2, 32], strides = [1, 1]} : vector<2x96xf32> to vector<2x32xf32>
    %91 = arith.mulf %89, %79 : vector<2x32xf32>
    %92 = arith.mulf %88, %87 : vector<2x32xf32>
    %93 = arith.addf %91, %92 : vector<2x32xf32>
    %94 = math.tanh %93 : vector<2x32xf32>
    %95 = arith.mulf %90, %94 : vector<2x32xf32>
    %c0_47 = arith.constant 0 : index
    %c0_48 = arith.constant 0 : index
    %c0_49 = arith.constant 0 : index
    %96 = vector.load %arg10[%c0_47, %c0_48, %c0_49] : memref<2x2x32xf32, #tpu.memory_space<vmem>>, vector<1x2x32xf32>
    %97 = vector.shape_cast %96 : vector<1x2x32xf32> to vector<2x32xf32>
    %98 = vector.shape_cast %95 : vector<2x32xf32> to vector<1x2x32xf32>
    tpu.vector_store %arg10[%c0_47, %c0_48, %c0_49], %98 {strides = array<i32>} : memref<2x2x32xf32, #tpu.memory_space<vmem>>, vector<1x2x32xf32>,
    %c0_50 = arith.constant 0 : index
    %c0_51 = arith.constant 0 : index
    %c0_52 = arith.constant 0 : index
    %99 = vector.load %arg11[%c0_50, %c0_51, %c0_52] : memref<2x2x32xf32, #tpu.memory_space<vmem>>, vector<1x2x32xf32>
    %100 = vector.shape_cast %99 : vector<1x2x32xf32> to vector<2x32xf32>
    %101 = vector.shape_cast %93 : vector<2x32xf32> to vector<1x2x32xf32>
    tpu.vector_store %arg11[%c0_50, %c0_51, %c0_52], %101 {strides = array<i32>} : memref<2x2x32xf32, #tpu.memory_space<vmem>>, vector<1x2x32xf32>,
    %c1_53 = arith.constant 1 : index
    %c0_54 = arith.constant 0 : index
    %c0_55 = arith.constant 0 : index
    %102 = vector.load %arg10[%c1_53, %c0_54, %c0_55] : memref<2x2x32xf32, #tpu.memory_space<vmem>>, vector<1x2x32xf32>
    %103 = vector.shape_cast %102 : vector<1x2x32xf32> to vector<2x32xf32>
    %104 = tpu.concatenate %95, %103 in 1 : vector<2x32xf32>, vector<2x32xf32> -> vector<2x64xf32>
    %cst_56 = arith.constant dense<0.000000e+00> : vector<2x128xf32>
    %105 = tpu.matmul %104, %4, %cst_56 {dimension_numbers = #tpu.dot_dimension_numbers<[1], [0], [0], [1], [0, 0, 1, 1], [], []>} : vector<2x64xf32>, vector<64x128xf32>, vector<2x128xf32> -> vector<2x128xf32>
    %106 = vector.broadcast %5 : vector<1x128xf32> to vector<2x128xf32>
    %107 = arith.addf %105, %106 : vector<2x128xf32>
    %c1_57 = arith.constant 1 : index
    %c0_58 = arith.constant 0 : index
    %c0_59 = arith.constant 0 : index
    %108 = vector.load %arg11[%c1_57, %c0_58, %c0_59] : memref<2x2x32xf32, #tpu.memory_space<vmem>>, vector<1x2x32xf32>
    %109 = vector.shape_cast %108 : vector<1x2x32xf32> to vector<2x32xf32>
    %110 = vector.extract_strided_slice %107 {offsets = [0, 0], sizes = [2, 96], strides = [1, 1]} : vector<2x128xf32> to vector<2x96xf32>
    %111 = arith.negf %110 : vector<2x96xf32>
    %112 = math.exp %111 : vector<2x96xf32>
    %cst_60 = arith.constant 1.000000e+00 : f32
    %113 = vector.broadcast %cst_60 : f32 to vector<2x96xf32>
    %114 = arith.addf %113, %112 : vector<2x96xf32>
    %115 = arith.divf %113, %114 : vector<2x96xf32>
    %116 = vector.extract_strided_slice %107 {offsets = [0, 96], sizes = [2, 32], strides = [1, 1]} : vector<2x128xf32> to vector<2x32xf32>
    %117 = math.tanh %116 : vector<2x32xf32>
    %118 = vector.extract_strided_slice %115 {offsets = [0, 0], sizes = [2, 32], strides = [1, 1]} : vector<2x96xf32> to vector<2x32xf32>
    %119 = vector.extract_strided_slice %115 {offsets = [0, 32], sizes = [2, 32], strides = [1, 1]} : vector<2x96xf32> to vector<2x32xf32>
    %120 = vector.extract_strided_slice %115 {offsets = [0, 64], sizes = [2, 32], strides = [1, 1]} : vector<2x96xf32> to vector<2x32xf32>
    %121 = arith.mulf %119, %109 : vector<2x32xf32>
    %122 = arith.mulf %118, %117 : vector<2x32xf32>
    %123 = arith.addf %121, %122 : vector<2x32xf32>
    %124 = math.tanh %123 : vector<2x32xf32>
    %125 = arith.mulf %120, %124 : vector<2x32xf32>
    %c1_61 = arith.constant 1 : index
    %c0_62 = arith.constant 0 : index
    %c0_63 = arith.constant 0 : index
    %126 = vector.load %arg10[%c1_61, %c0_62, %c0_63] : memref<2x2x32xf32, #tpu.memory_space<vmem>>, vector<1x2x32xf32>
    %127 = vector.shape_cast %126 : vector<1x2x32xf32> to vector<2x32xf32>
    %128 = vector.shape_cast %125 : vector<2x32xf32> to vector<1x2x32xf32>
    tpu.vector_store %arg10[%c1_61, %c0_62, %c0_63], %128 {strides = array<i32>} : memref<2x2x32xf32, #tpu.memory_space<vmem>>, vector<1x2x32xf32>,
    %c1_64 = arith.constant 1 : index
    %c0_65 = arith.constant 0 : index
    %c0_66 = arith.constant 0 : index
    %129 = vector.load %arg11[%c1_64, %c0_65, %c0_66] : memref<2x2x32xf32, #tpu.memory_space<vmem>>, vector<1x2x32xf32>
    %130 = vector.shape_cast %129 : vector<1x2x32xf32> to vector<2x32xf32>
    %131 = vector.shape_cast %123 : vector<2x32xf32> to vector<1x2x32xf32>
    tpu.vector_store %arg11[%c1_64, %c0_65, %c0_66], %131 {strides = array<i32>} : memref<2x2x32xf32, #tpu.memory_space<vmem>>, vector<1x2x32xf32>,
    %132 = arith.index_cast %c1_i32 : i32 to index
    %c0_67 = arith.constant 0 : index
    %c0_68 = arith.constant 0 : index
    %133 = vector.load %arg7[%132, %c0_67, %c0_68] : memref<8x2x32xf32, #tpu.memory_space<vmem>>, vector<1x2x32xf32>
    %134 = vector.shape_cast %133 : vector<1x2x32xf32> to vector<2x32xf32>
    %135 = vector.shape_cast %125 : vector<2x32xf32> to vector<1x2x32xf32>
    tpu.vector_store %arg7[%132, %c0_67, %c0_68], %135 {strides = array<i32>} : memref<8x2x32xf32, #tpu.memory_space<vmem>>, vector<1x2x32xf32>,
    %c2_i32 = arith.constant 2 : i32
    %136 = arith.index_cast %c2_i32 : i32 to index
    %c0_69 = arith.constant 0 : index
    %c0_70 = arith.constant 0 : index
    %137 = vector.load %arg1[%136, %c0_69, %c0_70] : memref<8x2x128xf32, #tpu.memory_space<vmem>>, vector<1x2x128xf32>
    %138 = vector.shape_cast %137 : vector<1x2x128xf32> to vector<2x128xf32>
    %c0_71 = arith.constant 0 : index
    %c0_72 = arith.constant 0 : index
    %c0_73 = arith.constant 0 : index
    %139 = vector.load %arg10[%c0_71, %c0_72, %c0_73] : memref<2x2x32xf32, #tpu.memory_space<vmem>>, vector<1x2x32xf32>
    %140 = vector.shape_cast %139 : vector<1x2x32xf32> to vector<2x32xf32>
    %cst_74 = arith.constant dense<0.000000e+00> : vector<2x128xf32>
    %141 = tpu.matmul %140, %3, %cst_74 {dimension_numbers = #tpu.dot_dimension_numbers<[1], [0], [0], [1], [0, 0, 1, 1], [], []>} : vector<2x32xf32>, vector<32x128xf32>, vector<2x128xf32> -> vector<2x128xf32>
    %142 = arith.addf %138, %141 : vector<2x128xf32>
    %c0_75 = arith.constant 0 : index
    %c0_76 = arith.constant 0 : index
    %c0_77 = arith.constant 0 : index
    %143 = vector.load %arg11[%c0_75, %c0_76, %c0_77] : memref<2x2x32xf32, #tpu.memory_space<vmem>>, vector<1x2x32xf32>
    %144 = vector.shape_cast %143 : vector<1x2x32xf32> to vector<2x32xf32>
    %145 = vector.extract_strided_slice %142 {offsets = [0, 0], sizes = [2, 96], strides = [1, 1]} : vector<2x128xf32> to vector<2x96xf32>
    %146 = arith.negf %145 : vector<2x96xf32>
    %147 = math.exp %146 : vector<2x96xf32>
    %cst_78 = arith.constant 1.000000e+00 : f32
    %148 = vector.broadcast %cst_78 : f32 to vector<2x96xf32>
    %149 = arith.addf %148, %147 : vector<2x96xf32>
    %150 = arith.divf %148, %149 : vector<2x96xf32>
    %151 = vector.extract_strided_slice %142 {offsets = [0, 96], sizes = [2, 32], strides = [1, 1]} : vector<2x128xf32> to vector<2x32xf32>
    %152 = math.tanh %151 : vector<2x32xf32>
    %153 = vector.extract_strided_slice %150 {offsets = [0, 0], sizes = [2, 32], strides = [1, 1]} : vector<2x96xf32> to vector<2x32xf32>
    %154 = vector.extract_strided_slice %150 {offsets = [0, 32], sizes = [2, 32], strides = [1, 1]} : vector<2x96xf32> to vector<2x32xf32>
    %155 = vector.extract_strided_slice %150 {offsets = [0, 64], sizes = [2, 32], strides = [1, 1]} : vector<2x96xf32> to vector<2x32xf32>
    %156 = arith.mulf %154, %144 : vector<2x32xf32>
    %157 = arith.mulf %153, %152 : vector<2x32xf32>
    %158 = arith.addf %156, %157 : vector<2x32xf32>
    %159 = math.tanh %158 : vector<2x32xf32>
    %160 = arith.mulf %155, %159 : vector<2x32xf32>
    %c0_79 = arith.constant 0 : index
    %c0_80 = arith.constant 0 : index
    %c0_81 = arith.constant 0 : index
    %161 = vector.load %arg10[%c0_79, %c0_80, %c0_81] : memref<2x2x32xf32, #tpu.memory_space<vmem>>, vector<1x2x32xf32>
    %162 = vector.shape_cast %161 : vector<1x2x32xf32> to vector<2x32xf32>
    %163 = vector.shape_cast %160 : vector<2x32xf32> to vector<1x2x32xf32>
    tpu.vector_store %arg10[%c0_79, %c0_80, %c0_81], %163 {strides = array<i32>} : memref<2x2x32xf32, #tpu.memory_space<vmem>>, vector<1x2x32xf32>,
    %c0_82 = arith.constant 0 : index
    %c0_83 = arith.constant 0 : index
    %c0_84 = arith.constant 0 : index
    %164 = vector.load %arg11[%c0_82, %c0_83, %c0_84] : memref<2x2x32xf32, #tpu.memory_space<vmem>>, vector<1x2x32xf32>
    %165 = vector.shape_cast %164 : vector<1x2x32xf32> to vector<2x32xf32>
    %166 = vector.shape_cast %158 : vector<2x32xf32> to vector<1x2x32xf32>
    tpu.vector_store %arg11[%c0_82, %c0_83, %c0_84], %166 {strides = array<i32>} : memref<2x2x32xf32, #tpu.memory_space<vmem>>, vector<1x2x32xf32>,
    %c1_85 = arith.constant 1 : index
    %c0_86 = arith.constant 0 : index
    %c0_87 = arith.constant 0 : index
    %167 = vector.load %arg10[%c1_85, %c0_86, %c0_87] : memref<2x2x32xf32, #tpu.memory_space<vmem>>, vector<1x2x32xf32>
    %168 = vector.shape_cast %167 : vector<1x2x32xf32> to vector<2x32xf32>
    %169 = tpu.concatenate %160, %168 in 1 : vector<2x32xf32>, vector<2x32xf32> -> vector<2x64xf32>
    %cst_88 = arith.constant dense<0.000000e+00> : vector<2x128xf32>
    %170 = tpu.matmul %169, %4, %cst_88 {dimension_numbers = #tpu.dot_dimension_numbers<[1], [0], [0], [1], [0, 0, 1, 1], [], []>} : vector<2x64xf32>, vector<64x128xf32>, vector<2x128xf32> -> vector<2x128xf32>
    %171 = vector.broadcast %5 : vector<1x128xf32> to vector<2x128xf32>
    %172 = arith.addf %170, %171 : vector<2x128xf32>
    %c1_89 = arith.constant 1 : index
    %c0_90 = arith.constant 0 : index
    %c0_91 = arith.constant 0 : index
    %173 = vector.load %arg11[%c1_89, %c0_90, %c0_91] : memref<2x2x32xf32, #tpu.memory_space<vmem>>, vector<1x2x32xf32>
    %174 = vector.shape_cast %173 : vector<1x2x32xf32> to vector<2x32xf32>
    %175 = vector.extract_strided_slice %172 {offsets = [0, 0], sizes = [2, 96], strides = [1, 1]} : vector<2x128xf32> to vector<2x96xf32>
    %176 = arith.negf %175 : vector<2x96xf32>
    %177 = math.exp %176 : vector<2x96xf32>
    %cst_92 = arith.constant 1.000000e+00 : f32
    %178 = vector.broadcast %cst_92 : f32 to vector<2x96xf32>
    %179 = arith.addf %178, %177 : vector<2x96xf32>
    %180 = arith.divf %178, %179 : vector<2x96xf32>
    %181 = vector.extract_strided_slice %172 {offsets = [0, 96], sizes = [2, 32], strides = [1, 1]} : vector<2x128xf32> to vector<2x32xf32>
    %182 = math.tanh %181 : vector<2x32xf32>
    %183 = vector.extract_strided_slice %180 {offsets = [0, 0], sizes = [2, 32], strides = [1, 1]} : vector<2x96xf32> to vector<2x32xf32>
    %184 = vector.extract_strided_slice %180 {offsets = [0, 32], sizes = [2, 32], strides = [1, 1]} : vector<2x96xf32> to vector<2x32xf32>
    %185 = vector.extract_strided_slice %180 {offsets = [0, 64], sizes = [2, 32], strides = [1, 1]} : vector<2x96xf32> to vector<2x32xf32>
    %186 = arith.mulf %184, %174 : vector<2x32xf32>
    %187 = arith.mulf %183, %182 : vector<2x32xf32>
    %188 = arith.addf %186, %187 : vector<2x32xf32>
    %189 = math.tanh %188 : vector<2x32xf32>
    %190 = arith.mulf %185, %189 : vector<2x32xf32>
    %c1_93 = arith.constant 1 : index
    %c0_94 = arith.constant 0 : index
    %c0_95 = arith.constant 0 : index
    %191 = vector.load %arg10[%c1_93, %c0_94, %c0_95] : memref<2x2x32xf32, #tpu.memory_space<vmem>>, vector<1x2x32xf32>
    %192 = vector.shape_cast %191 : vector<1x2x32xf32> to vector<2x32xf32>
    %193 = vector.shape_cast %190 : vector<2x32xf32> to vector<1x2x32xf32>
    tpu.vector_store %arg10[%c1_93, %c0_94, %c0_95], %193 {strides = array<i32>} : memref<2x2x32xf32, #tpu.memory_space<vmem>>, vector<1x2x32xf32>,
    %c1_96 = arith.constant 1 : index
    %c0_97 = arith.constant 0 : index
    %c0_98 = arith.constant 0 : index
    %194 = vector.load %arg11[%c1_96, %c0_97, %c0_98] : memref<2x2x32xf32, #tpu.memory_space<vmem>>, vector<1x2x32xf32>
    %195 = vector.shape_cast %194 : vector<1x2x32xf32> to vector<2x32xf32>
    %196 = vector.shape_cast %188 : vector<2x32xf32> to vector<1x2x32xf32>
    tpu.vector_store %arg11[%c1_96, %c0_97, %c0_98], %196 {strides = array<i32>} : memref<2x2x32xf32, #tpu.memory_space<vmem>>, vector<1x2x32xf32>,
    %197 = arith.index_cast %c2_i32 : i32 to index
    %c0_99 = arith.constant 0 : index
    %c0_100 = arith.constant 0 : index
    %198 = vector.load %arg7[%197, %c0_99, %c0_100] : memref<8x2x32xf32, #tpu.memory_space<vmem>>, vector<1x2x32xf32>
    %199 = vector.shape_cast %198 : vector<1x2x32xf32> to vector<2x32xf32>
    %200 = vector.shape_cast %190 : vector<2x32xf32> to vector<1x2x32xf32>
    tpu.vector_store %arg7[%197, %c0_99, %c0_100], %200 {strides = array<i32>} : memref<8x2x32xf32, #tpu.memory_space<vmem>>, vector<1x2x32xf32>,
    %c3_i32 = arith.constant 3 : i32
    %201 = arith.index_cast %c3_i32 : i32 to index
    %c0_101 = arith.constant 0 : index
    %c0_102 = arith.constant 0 : index
    %202 = vector.load %arg1[%201, %c0_101, %c0_102] : memref<8x2x128xf32, #tpu.memory_space<vmem>>, vector<1x2x128xf32>
    %203 = vector.shape_cast %202 : vector<1x2x128xf32> to vector<2x128xf32>
    %c0_103 = arith.constant 0 : index
    %c0_104 = arith.constant 0 : index
    %c0_105 = arith.constant 0 : index
    %204 = vector.load %arg10[%c0_103, %c0_104, %c0_105] : memref<2x2x32xf32, #tpu.memory_space<vmem>>, vector<1x2x32xf32>
    %205 = vector.shape_cast %204 : vector<1x2x32xf32> to vector<2x32xf32>
    %cst_106 = arith.constant dense<0.000000e+00> : vector<2x128xf32>
    %206 = tpu.matmul %205, %3, %cst_106 {dimension_numbers = #tpu.dot_dimension_numbers<[1], [0], [0], [1], [0, 0, 1, 1], [], []>} : vector<2x32xf32>, vector<32x128xf32>, vector<2x128xf32> -> vector<2x128xf32>
    %207 = arith.addf %203, %206 : vector<2x128xf32>
    %c0_107 = arith.constant 0 : index
    %c0_108 = arith.constant 0 : index
    %c0_109 = arith.constant 0 : index
    %208 = vector.load %arg11[%c0_107, %c0_108, %c0_109] : memref<2x2x32xf32, #tpu.memory_space<vmem>>, vector<1x2x32xf32>
    %209 = vector.shape_cast %208 : vector<1x2x32xf32> to vector<2x32xf32>
    %210 = vector.extract_strided_slice %207 {offsets = [0, 0], sizes = [2, 96], strides = [1, 1]} : vector<2x128xf32> to vector<2x96xf32>
    %211 = arith.negf %210 : vector<2x96xf32>
    %212 = math.exp %211 : vector<2x96xf32>
    %cst_110 = arith.constant 1.000000e+00 : f32
    %213 = vector.broadcast %cst_110 : f32 to vector<2x96xf32>
    %214 = arith.addf %213, %212 : vector<2x96xf32>
    %215 = arith.divf %213, %214 : vector<2x96xf32>
    %216 = vector.extract_strided_slice %207 {offsets = [0, 96], sizes = [2, 32], strides = [1, 1]} : vector<2x128xf32> to vector<2x32xf32>
    %217 = math.tanh %216 : vector<2x32xf32>
    %218 = vector.extract_strided_slice %215 {offsets = [0, 0], sizes = [2, 32], strides = [1, 1]} : vector<2x96xf32> to vector<2x32xf32>
    %219 = vector.extract_strided_slice %215 {offsets = [0, 32], sizes = [2, 32], strides = [1, 1]} : vector<2x96xf32> to vector<2x32xf32>
    %220 = vector.extract_strided_slice %215 {offsets = [0, 64], sizes = [2, 32], strides = [1, 1]} : vector<2x96xf32> to vector<2x32xf32>
    %221 = arith.mulf %219, %209 : vector<2x32xf32>
    %222 = arith.mulf %218, %217 : vector<2x32xf32>
    %223 = arith.addf %221, %222 : vector<2x32xf32>
    %224 = math.tanh %223 : vector<2x32xf32>
    %225 = arith.mulf %220, %224 : vector<2x32xf32>
    %c0_111 = arith.constant 0 : index
    %c0_112 = arith.constant 0 : index
    %c0_113 = arith.constant 0 : index
    %226 = vector.load %arg10[%c0_111, %c0_112, %c0_113] : memref<2x2x32xf32, #tpu.memory_space<vmem>>, vector<1x2x32xf32>
    %227 = vector.shape_cast %226 : vector<1x2x32xf32> to vector<2x32xf32>
    %228 = vector.shape_cast %225 : vector<2x32xf32> to vector<1x2x32xf32>
    tpu.vector_store %arg10[%c0_111, %c0_112, %c0_113], %228 {strides = array<i32>} : memref<2x2x32xf32, #tpu.memory_space<vmem>>, vector<1x2x32xf32>,
    %c0_114 = arith.constant 0 : index
    %c0_115 = arith.constant 0 : index
    %c0_116 = arith.constant 0 : index
    %229 = vector.load %arg11[%c0_114, %c0_115, %c0_116] : memref<2x2x32xf32, #tpu.memory_space<vmem>>, vector<1x2x32xf32>
    %230 = vector.shape_cast %229 : vector<1x2x32xf32> to vector<2x32xf32>
    %231 = vector.shape_cast %223 : vector<2x32xf32> to vector<1x2x32xf32>
    tpu.vector_store %arg11[%c0_114, %c0_115, %c0_116], %231 {strides = array<i32>} : memref<2x2x32xf32, #tpu.memory_space<vmem>>, vector<1x2x32xf32>,
    %c1_117 = arith.constant 1 : index
    %c0_118 = arith.constant 0 : index
    %c0_119 = arith.constant 0 : index
    %232 = vector.load %arg10[%c1_117, %c0_118, %c0_119] : memref<2x2x32xf32, #tpu.memory_space<vmem>>, vector<1x2x32xf32>
    %233 = vector.shape_cast %232 : vector<1x2x32xf32> to vector<2x32xf32>
    %234 = tpu.concatenate %225, %233 in 1 : vector<2x32xf32>, vector<2x32xf32> -> vector<2x64xf32>
    %cst_120 = arith.constant dense<0.000000e+00> : vector<2x128xf32>
    %235 = tpu.matmul %234, %4, %cst_120 {dimension_numbers = #tpu.dot_dimension_numbers<[1], [0], [0], [1], [0, 0, 1, 1], [], []>} : vector<2x64xf32>, vector<64x128xf32>, vector<2x128xf32> -> vector<2x128xf32>
    %236 = vector.broadcast %5 : vector<1x128xf32> to vector<2x128xf32>
    %237 = arith.addf %235, %236 : vector<2x128xf32>
    %c1_121 = arith.constant 1 : index
    %c0_122 = arith.constant 0 : index
    %c0_123 = arith.constant 0 : index
    %238 = vector.load %arg11[%c1_121, %c0_122, %c0_123] : memref<2x2x32xf32, #tpu.memory_space<vmem>>, vector<1x2x32xf32>
    %239 = vector.shape_cast %238 : vector<1x2x32xf32> to vector<2x32xf32>
    %240 = vector.extract_strided_slice %237 {offsets = [0, 0], sizes = [2, 96], strides = [1, 1]} : vector<2x128xf32> to vector<2x96xf32>
    %241 = arith.negf %240 : vector<2x96xf32>
    %242 = math.exp %241 : vector<2x96xf32>
    %cst_124 = arith.constant 1.000000e+00 : f32
    %243 = vector.broadcast %cst_124 : f32 to vector<2x96xf32>
    %244 = arith.addf %243, %242 : vector<2x96xf32>
    %245 = arith.divf %243, %244 : vector<2x96xf32>
    %246 = vector.extract_strided_slice %237 {offsets = [0, 96], sizes = [2, 32], strides = [1, 1]} : vector<2x128xf32> to vector<2x32xf32>
    %247 = math.tanh %246 : vector<2x32xf32>
    %248 = vector.extract_strided_slice %245 {offsets = [0, 0], sizes = [2, 32], strides = [1, 1]} : vector<2x96xf32> to vector<2x32xf32>
    %249 = vector.extract_strided_slice %245 {offsets = [0, 32], sizes = [2, 32], strides = [1, 1]} : vector<2x96xf32> to vector<2x32xf32>
    %250 = vector.extract_strided_slice %245 {offsets = [0, 64], sizes = [2, 32], strides = [1, 1]} : vector<2x96xf32> to vector<2x32xf32>
    %251 = arith.mulf %249, %239 : vector<2x32xf32>
    %252 = arith.mulf %248, %247 : vector<2x32xf32>
    %253 = arith.addf %251, %252 : vector<2x32xf32>
    %254 = math.tanh %253 : vector<2x32xf32>
    %255 = arith.mulf %250, %254 : vector<2x32xf32>
    %c1_125 = arith.constant 1 : index
    %c0_126 = arith.constant 0 : index
    %c0_127 = arith.constant 0 : index
    %256 = vector.load %arg10[%c1_125, %c0_126, %c0_127] : memref<2x2x32xf32, #tpu.memory_space<vmem>>, vector<1x2x32xf32>
    %257 = vector.shape_cast %256 : vector<1x2x32xf32> to vector<2x32xf32>
    %258 = vector.shape_cast %255 : vector<2x32xf32> to vector<1x2x32xf32>
    tpu.vector_store %arg10[%c1_125, %c0_126, %c0_127], %258 {strides = array<i32>} : memref<2x2x32xf32, #tpu.memory_space<vmem>>, vector<1x2x32xf32>,
    %c1_128 = arith.constant 1 : index
    %c0_129 = arith.constant 0 : index
    %c0_130 = arith.constant 0 : index
    %259 = vector.load %arg11[%c1_128, %c0_129, %c0_130] : memref<2x2x32xf32, #tpu.memory_space<vmem>>, vector<1x2x32xf32>
    %260 = vector.shape_cast %259 : vector<1x2x32xf32> to vector<2x32xf32>
    %261 = vector.shape_cast %253 : vector<2x32xf32> to vector<1x2x32xf32>
    tpu.vector_store %arg11[%c1_128, %c0_129, %c0_130], %261 {strides = array<i32>} : memref<2x2x32xf32, #tpu.memory_space<vmem>>, vector<1x2x32xf32>,
    %262 = arith.index_cast %c3_i32 : i32 to index
    %c0_131 = arith.constant 0 : index
    %c0_132 = arith.constant 0 : index
    %263 = vector.load %arg7[%262, %c0_131, %c0_132] : memref<8x2x32xf32, #tpu.memory_space<vmem>>, vector<1x2x32xf32>
    %264 = vector.shape_cast %263 : vector<1x2x32xf32> to vector<2x32xf32>
    %265 = vector.shape_cast %255 : vector<2x32xf32> to vector<1x2x32xf32>
    tpu.vector_store %arg7[%262, %c0_131, %c0_132], %265 {strides = array<i32>} : memref<8x2x32xf32, #tpu.memory_space<vmem>>, vector<1x2x32xf32>,
    %c4_i32 = arith.constant 4 : i32
    %266 = arith.index_cast %c4_i32 : i32 to index
    %c0_133 = arith.constant 0 : index
    %c0_134 = arith.constant 0 : index
    %267 = vector.load %arg1[%266, %c0_133, %c0_134] : memref<8x2x128xf32, #tpu.memory_space<vmem>>, vector<1x2x128xf32>
    %268 = vector.shape_cast %267 : vector<1x2x128xf32> to vector<2x128xf32>
    %c0_135 = arith.constant 0 : index
    %c0_136 = arith.constant 0 : index
    %c0_137 = arith.constant 0 : index
    %269 = vector.load %arg10[%c0_135, %c0_136, %c0_137] : memref<2x2x32xf32, #tpu.memory_space<vmem>>, vector<1x2x32xf32>
    %270 = vector.shape_cast %269 : vector<1x2x32xf32> to vector<2x32xf32>
    %cst_138 = arith.constant dense<0.000000e+00> : vector<2x128xf32>
    %271 = tpu.matmul %270, %3, %cst_138 {dimension_numbers = #tpu.dot_dimension_numbers<[1], [0], [0], [1], [0, 0, 1, 1], [], []>} : vector<2x32xf32>, vector<32x128xf32>, vector<2x128xf32> -> vector<2x128xf32>
    %272 = arith.addf %268, %271 : vector<2x128xf32>
    %c0_139 = arith.constant 0 : index
    %c0_140 = arith.constant 0 : index
    %c0_141 = arith.constant 0 : index
    %273 = vector.load %arg11[%c0_139, %c0_140, %c0_141] : memref<2x2x32xf32, #tpu.memory_space<vmem>>, vector<1x2x32xf32>
    %274 = vector.shape_cast %273 : vector<1x2x32xf32> to vector<2x32xf32>
    %275 = vector.extract_strided_slice %272 {offsets = [0, 0], sizes = [2, 96], strides = [1, 1]} : vector<2x128xf32> to vector<2x96xf32>
    %276 = arith.negf %275 : vector<2x96xf32>
    %277 = math.exp %276 : vector<2x96xf32>
    %cst_142 = arith.constant 1.000000e+00 : f32
    %278 = vector.broadcast %cst_142 : f32 to vector<2x96xf32>
    %279 = arith.addf %278, %277 : vector<2x96xf32>
    %280 = arith.divf %278, %279 : vector<2x96xf32>
    %281 = vector.extract_strided_slice %272 {offsets = [0, 96], sizes = [2, 32], strides = [1, 1]} : vector<2x128xf32> to vector<2x32xf32>
    %282 = math.tanh %281 : vector<2x32xf32>
    %283 = vector.extract_strided_slice %280 {offsets = [0, 0], sizes = [2, 32], strides = [1, 1]} : vector<2x96xf32> to vector<2x32xf32>
    %284 = vector.extract_strided_slice %280 {offsets = [0, 32], sizes = [2, 32], strides = [1, 1]} : vector<2x96xf32> to vector<2x32xf32>
    %285 = vector.extract_strided_slice %280 {offsets = [0, 64], sizes = [2, 32], strides = [1, 1]} : vector<2x96xf32> to vector<2x32xf32>
    %286 = arith.mulf %284, %274 : vector<2x32xf32>
    %287 = arith.mulf %283, %282 : vector<2x32xf32>
    %288 = arith.addf %286, %287 : vector<2x32xf32>
    %289 = math.tanh %288 : vector<2x32xf32>
    %290 = arith.mulf %285, %289 : vector<2x32xf32>
    %c0_143 = arith.constant 0 : index
    %c0_144 = arith.constant 0 : index
    %c0_145 = arith.constant 0 : index
    %291 = vector.load %arg10[%c0_143, %c0_144, %c0_145] : memref<2x2x32xf32, #tpu.memory_space<vmem>>, vector<1x2x32xf32>
    %292 = vector.shape_cast %291 : vector<1x2x32xf32> to vector<2x32xf32>
    %293 = vector.shape_cast %290 : vector<2x32xf32> to vector<1x2x32xf32>
    tpu.vector_store %arg10[%c0_143, %c0_144, %c0_145], %293 {strides = array<i32>} : memref<2x2x32xf32, #tpu.memory_space<vmem>>, vector<1x2x32xf32>,
    %c0_146 = arith.constant 0 : index
    %c0_147 = arith.constant 0 : index
    %c0_148 = arith.constant 0 : index
    %294 = vector.load %arg11[%c0_146, %c0_147, %c0_148] : memref<2x2x32xf32, #tpu.memory_space<vmem>>, vector<1x2x32xf32>
    %295 = vector.shape_cast %294 : vector<1x2x32xf32> to vector<2x32xf32>
    %296 = vector.shape_cast %288 : vector<2x32xf32> to vector<1x2x32xf32>
    tpu.vector_store %arg11[%c0_146, %c0_147, %c0_148], %296 {strides = array<i32>} : memref<2x2x32xf32, #tpu.memory_space<vmem>>, vector<1x2x32xf32>,
    %c1_149 = arith.constant 1 : index
    %c0_150 = arith.constant 0 : index
    %c0_151 = arith.constant 0 : index
    %297 = vector.load %arg10[%c1_149, %c0_150, %c0_151] : memref<2x2x32xf32, #tpu.memory_space<vmem>>, vector<1x2x32xf32>
    %298 = vector.shape_cast %297 : vector<1x2x32xf32> to vector<2x32xf32>
    %299 = tpu.concatenate %290, %298 in 1 : vector<2x32xf32>, vector<2x32xf32> -> vector<2x64xf32>
    %cst_152 = arith.constant dense<0.000000e+00> : vector<2x128xf32>
    %300 = tpu.matmul %299, %4, %cst_152 {dimension_numbers = #tpu.dot_dimension_numbers<[1], [0], [0], [1], [0, 0, 1, 1], [], []>} : vector<2x64xf32>, vector<64x128xf32>, vector<2x128xf32> -> vector<2x128xf32>
    %301 = vector.broadcast %5 : vector<1x128xf32> to vector<2x128xf32>
    %302 = arith.addf %300, %301 : vector<2x128xf32>
    %c1_153 = arith.constant 1 : index
    %c0_154 = arith.constant 0 : index
    %c0_155 = arith.constant 0 : index
    %303 = vector.load %arg11[%c1_153, %c0_154, %c0_155] : memref<2x2x32xf32, #tpu.memory_space<vmem>>, vector<1x2x32xf32>
    %304 = vector.shape_cast %303 : vector<1x2x32xf32> to vector<2x32xf32>
    %305 = vector.extract_strided_slice %302 {offsets = [0, 0], sizes = [2, 96], strides = [1, 1]} : vector<2x128xf32> to vector<2x96xf32>
    %306 = arith.negf %305 : vector<2x96xf32>
    %307 = math.exp %306 : vector<2x96xf32>
    %cst_156 = arith.constant 1.000000e+00 : f32
    %308 = vector.broadcast %cst_156 : f32 to vector<2x96xf32>
    %309 = arith.addf %308, %307 : vector<2x96xf32>
    %310 = arith.divf %308, %309 : vector<2x96xf32>
    %311 = vector.extract_strided_slice %302 {offsets = [0, 96], sizes = [2, 32], strides = [1, 1]} : vector<2x128xf32> to vector<2x32xf32>
    %312 = math.tanh %311 : vector<2x32xf32>
    %313 = vector.extract_strided_slice %310 {offsets = [0, 0], sizes = [2, 32], strides = [1, 1]} : vector<2x96xf32> to vector<2x32xf32>
    %314 = vector.extract_strided_slice %310 {offsets = [0, 32], sizes = [2, 32], strides = [1, 1]} : vector<2x96xf32> to vector<2x32xf32>
    %315 = vector.extract_strided_slice %310 {offsets = [0, 64], sizes = [2, 32], strides = [1, 1]} : vector<2x96xf32> to vector<2x32xf32>
    %316 = arith.mulf %314, %304 : vector<2x32xf32>
    %317 = arith.mulf %313, %312 : vector<2x32xf32>
    %318 = arith.addf %316, %317 : vector<2x32xf32>
    %319 = math.tanh %318 : vector<2x32xf32>
    %320 = arith.mulf %315, %319 : vector<2x32xf32>
    %c1_157 = arith.constant 1 : index
    %c0_158 = arith.constant 0 : index
    %c0_159 = arith.constant 0 : index
    %321 = vector.load %arg10[%c1_157, %c0_158, %c0_159] : memref<2x2x32xf32, #tpu.memory_space<vmem>>, vector<1x2x32xf32>
    %322 = vector.shape_cast %321 : vector<1x2x32xf32> to vector<2x32xf32>
    %323 = vector.shape_cast %320 : vector<2x32xf32> to vector<1x2x32xf32>
    tpu.vector_store %arg10[%c1_157, %c0_158, %c0_159], %323 {strides = array<i32>} : memref<2x2x32xf32, #tpu.memory_space<vmem>>, vector<1x2x32xf32>,
    %c1_160 = arith.constant 1 : index
    %c0_161 = arith.constant 0 : index
    %c0_162 = arith.constant 0 : index
    %324 = vector.load %arg11[%c1_160, %c0_161, %c0_162] : memref<2x2x32xf32, #tpu.memory_space<vmem>>, vector<1x2x32xf32>
    %325 = vector.shape_cast %324 : vector<1x2x32xf32> to vector<2x32xf32>
    %326 = vector.shape_cast %318 : vector<2x32xf32> to vector<1x2x32xf32>
    tpu.vector_store %arg11[%c1_160, %c0_161, %c0_162], %326 {strides = array<i32>} : memref<2x2x32xf32, #tpu.memory_space<vmem>>, vector<1x2x32xf32>,
    %327 = arith.index_cast %c4_i32 : i32 to index
    %c0_163 = arith.constant 0 : index
    %c0_164 = arith.constant 0 : index
    %328 = vector.load %arg7[%327, %c0_163, %c0_164] : memref<8x2x32xf32, #tpu.memory_space<vmem>>, vector<1x2x32xf32>
    %329 = vector.shape_cast %328 : vector<1x2x32xf32> to vector<2x32xf32>
    %330 = vector.shape_cast %320 : vector<2x32xf32> to vector<1x2x32xf32>
    tpu.vector_store %arg7[%327, %c0_163, %c0_164], %330 {strides = array<i32>} : memref<8x2x32xf32, #tpu.memory_space<vmem>>, vector<1x2x32xf32>,
    %c5_i32 = arith.constant 5 : i32
    %331 = arith.index_cast %c5_i32 : i32 to index
    %c0_165 = arith.constant 0 : index
    %c0_166 = arith.constant 0 : index
    %332 = vector.load %arg1[%331, %c0_165, %c0_166] : memref<8x2x128xf32, #tpu.memory_space<vmem>>, vector<1x2x128xf32>
    %333 = vector.shape_cast %332 : vector<1x2x128xf32> to vector<2x128xf32>
    %c0_167 = arith.constant 0 : index
    %c0_168 = arith.constant 0 : index
    %c0_169 = arith.constant 0 : index
    %334 = vector.load %arg10[%c0_167, %c0_168, %c0_169] : memref<2x2x32xf32, #tpu.memory_space<vmem>>, vector<1x2x32xf32>
    %335 = vector.shape_cast %334 : vector<1x2x32xf32> to vector<2x32xf32>
    %cst_170 = arith.constant dense<0.000000e+00> : vector<2x128xf32>
    %336 = tpu.matmul %335, %3, %cst_170 {dimension_numbers = #tpu.dot_dimension_numbers<[1], [0], [0], [1], [0, 0, 1, 1], [], []>} : vector<2x32xf32>, vector<32x128xf32>, vector<2x128xf32> -> vector<2x128xf32>
    %337 = arith.addf %333, %336 : vector<2x128xf32>
    %c0_171 = arith.constant 0 : index
    %c0_172 = arith.constant 0 : index
    %c0_173 = arith.constant 0 : index
    %338 = vector.load %arg11[%c0_171, %c0_172, %c0_173] : memref<2x2x32xf32, #tpu.memory_space<vmem>>, vector<1x2x32xf32>
    %339 = vector.shape_cast %338 : vector<1x2x32xf32> to vector<2x32xf32>
    %340 = vector.extract_strided_slice %337 {offsets = [0, 0], sizes = [2, 96], strides = [1, 1]} : vector<2x128xf32> to vector<2x96xf32>
    %341 = arith.negf %340 : vector<2x96xf32>
    %342 = math.exp %341 : vector<2x96xf32>
    %cst_174 = arith.constant 1.000000e+00 : f32
    %343 = vector.broadcast %cst_174 : f32 to vector<2x96xf32>
    %344 = arith.addf %343, %342 : vector<2x96xf32>
    %345 = arith.divf %343, %344 : vector<2x96xf32>
    %346 = vector.extract_strided_slice %337 {offsets = [0, 96], sizes = [2, 32], strides = [1, 1]} : vector<2x128xf32> to vector<2x32xf32>
    %347 = math.tanh %346 : vector<2x32xf32>
    %348 = vector.extract_strided_slice %345 {offsets = [0, 0], sizes = [2, 32], strides = [1, 1]} : vector<2x96xf32> to vector<2x32xf32>
    %349 = vector.extract_strided_slice %345 {offsets = [0, 32], sizes = [2, 32], strides = [1, 1]} : vector<2x96xf32> to vector<2x32xf32>
    %350 = vector.extract_strided_slice %345 {offsets = [0, 64], sizes = [2, 32], strides = [1, 1]} : vector<2x96xf32> to vector<2x32xf32>
    %351 = arith.mulf %349, %339 : vector<2x32xf32>
    %352 = arith.mulf %348, %347 : vector<2x32xf32>
    %353 = arith.addf %351, %352 : vector<2x32xf32>
    %354 = math.tanh %353 : vector<2x32xf32>
    %355 = arith.mulf %350, %354 : vector<2x32xf32>
    %c0_175 = arith.constant 0 : index
    %c0_176 = arith.constant 0 : index
    %c0_177 = arith.constant 0 : index
    %356 = vector.load %arg10[%c0_175, %c0_176, %c0_177] : memref<2x2x32xf32, #tpu.memory_space<vmem>>, vector<1x2x32xf32>
    %357 = vector.shape_cast %356 : vector<1x2x32xf32> to vector<2x32xf32>
    %358 = vector.shape_cast %355 : vector<2x32xf32> to vector<1x2x32xf32>
    tpu.vector_store %arg10[%c0_175, %c0_176, %c0_177], %358 {strides = array<i32>} : memref<2x2x32xf32, #tpu.memory_space<vmem>>, vector<1x2x32xf32>,
    %c0_178 = arith.constant 0 : index
    %c0_179 = arith.constant 0 : index
    %c0_180 = arith.constant 0 : index
    %359 = vector.load %arg11[%c0_178, %c0_179, %c0_180] : memref<2x2x32xf32, #tpu.memory_space<vmem>>, vector<1x2x32xf32>
    %360 = vector.shape_cast %359 : vector<1x2x32xf32> to vector<2x32xf32>
    %361 = vector.shape_cast %353 : vector<2x32xf32> to vector<1x2x32xf32>
    tpu.vector_store %arg11[%c0_178, %c0_179, %c0_180], %361 {strides = array<i32>} : memref<2x2x32xf32, #tpu.memory_space<vmem>>, vector<1x2x32xf32>,
    %c1_181 = arith.constant 1 : index
    %c0_182 = arith.constant 0 : index
    %c0_183 = arith.constant 0 : index
    %362 = vector.load %arg10[%c1_181, %c0_182, %c0_183] : memref<2x2x32xf32, #tpu.memory_space<vmem>>, vector<1x2x32xf32>
    %363 = vector.shape_cast %362 : vector<1x2x32xf32> to vector<2x32xf32>
    %364 = tpu.concatenate %355, %363 in 1 : vector<2x32xf32>, vector<2x32xf32> -> vector<2x64xf32>
    %cst_184 = arith.constant dense<0.000000e+00> : vector<2x128xf32>
    %365 = tpu.matmul %364, %4, %cst_184 {dimension_numbers = #tpu.dot_dimension_numbers<[1], [0], [0], [1], [0, 0, 1, 1], [], []>} : vector<2x64xf32>, vector<64x128xf32>, vector<2x128xf32> -> vector<2x128xf32>
    %366 = vector.broadcast %5 : vector<1x128xf32> to vector<2x128xf32>
    %367 = arith.addf %365, %366 : vector<2x128xf32>
    %c1_185 = arith.constant 1 : index
    %c0_186 = arith.constant 0 : index
    %c0_187 = arith.constant 0 : index
    %368 = vector.load %arg11[%c1_185, %c0_186, %c0_187] : memref<2x2x32xf32, #tpu.memory_space<vmem>>, vector<1x2x32xf32>
    %369 = vector.shape_cast %368 : vector<1x2x32xf32> to vector<2x32xf32>
    %370 = vector.extract_strided_slice %367 {offsets = [0, 0], sizes = [2, 96], strides = [1, 1]} : vector<2x128xf32> to vector<2x96xf32>
    %371 = arith.negf %370 : vector<2x96xf32>
    %372 = math.exp %371 : vector<2x96xf32>
    %cst_188 = arith.constant 1.000000e+00 : f32
    %373 = vector.broadcast %cst_188 : f32 to vector<2x96xf32>
    %374 = arith.addf %373, %372 : vector<2x96xf32>
    %375 = arith.divf %373, %374 : vector<2x96xf32>
    %376 = vector.extract_strided_slice %367 {offsets = [0, 96], sizes = [2, 32], strides = [1, 1]} : vector<2x128xf32> to vector<2x32xf32>
    %377 = math.tanh %376 : vector<2x32xf32>
    %378 = vector.extract_strided_slice %375 {offsets = [0, 0], sizes = [2, 32], strides = [1, 1]} : vector<2x96xf32> to vector<2x32xf32>
    %379 = vector.extract_strided_slice %375 {offsets = [0, 32], sizes = [2, 32], strides = [1, 1]} : vector<2x96xf32> to vector<2x32xf32>
    %380 = vector.extract_strided_slice %375 {offsets = [0, 64], sizes = [2, 32], strides = [1, 1]} : vector<2x96xf32> to vector<2x32xf32>
    %381 = arith.mulf %379, %369 : vector<2x32xf32>
    %382 = arith.mulf %378, %377 : vector<2x32xf32>
    %383 = arith.addf %381, %382 : vector<2x32xf32>
    %384 = math.tanh %383 : vector<2x32xf32>
    %385 = arith.mulf %380, %384 : vector<2x32xf32>
    %c1_189 = arith.constant 1 : index
    %c0_190 = arith.constant 0 : index
    %c0_191 = arith.constant 0 : index
    %386 = vector.load %arg10[%c1_189, %c0_190, %c0_191] : memref<2x2x32xf32, #tpu.memory_space<vmem>>, vector<1x2x32xf32>
    %387 = vector.shape_cast %386 : vector<1x2x32xf32> to vector<2x32xf32>
    %388 = vector.shape_cast %385 : vector<2x32xf32> to vector<1x2x32xf32>
    tpu.vector_store %arg10[%c1_189, %c0_190, %c0_191], %388 {strides = array<i32>} : memref<2x2x32xf32, #tpu.memory_space<vmem>>, vector<1x2x32xf32>,
    %c1_192 = arith.constant 1 : index
    %c0_193 = arith.constant 0 : index
    %c0_194 = arith.constant 0 : index
    %389 = vector.load %arg11[%c1_192, %c0_193, %c0_194] : memref<2x2x32xf32, #tpu.memory_space<vmem>>, vector<1x2x32xf32>
    %390 = vector.shape_cast %389 : vector<1x2x32xf32> to vector<2x32xf32>
    %391 = vector.shape_cast %383 : vector<2x32xf32> to vector<1x2x32xf32>
    tpu.vector_store %arg11[%c1_192, %c0_193, %c0_194], %391 {strides = array<i32>} : memref<2x2x32xf32, #tpu.memory_space<vmem>>, vector<1x2x32xf32>,
    %392 = arith.index_cast %c5_i32 : i32 to index
    %c0_195 = arith.constant 0 : index
    %c0_196 = arith.constant 0 : index
    %393 = vector.load %arg7[%392, %c0_195, %c0_196] : memref<8x2x32xf32, #tpu.memory_space<vmem>>, vector<1x2x32xf32>
    %394 = vector.shape_cast %393 : vector<1x2x32xf32> to vector<2x32xf32>
    %395 = vector.shape_cast %385 : vector<2x32xf32> to vector<1x2x32xf32>
    tpu.vector_store %arg7[%392, %c0_195, %c0_196], %395 {strides = array<i32>} : memref<8x2x32xf32, #tpu.memory_space<vmem>>, vector<1x2x32xf32>,
    %c6_i32 = arith.constant 6 : i32
    %396 = arith.index_cast %c6_i32 : i32 to index
    %c0_197 = arith.constant 0 : index
    %c0_198 = arith.constant 0 : index
    %397 = vector.load %arg1[%396, %c0_197, %c0_198] : memref<8x2x128xf32, #tpu.memory_space<vmem>>, vector<1x2x128xf32>
    %398 = vector.shape_cast %397 : vector<1x2x128xf32> to vector<2x128xf32>
    %c0_199 = arith.constant 0 : index
    %c0_200 = arith.constant 0 : index
    %c0_201 = arith.constant 0 : index
    %399 = vector.load %arg10[%c0_199, %c0_200, %c0_201] : memref<2x2x32xf32, #tpu.memory_space<vmem>>, vector<1x2x32xf32>
    %400 = vector.shape_cast %399 : vector<1x2x32xf32> to vector<2x32xf32>
    %cst_202 = arith.constant dense<0.000000e+00> : vector<2x128xf32>
    %401 = tpu.matmul %400, %3, %cst_202 {dimension_numbers = #tpu.dot_dimension_numbers<[1], [0], [0], [1], [0, 0, 1, 1], [], []>} : vector<2x32xf32>, vector<32x128xf32>, vector<2x128xf32> -> vector<2x128xf32>
    %402 = arith.addf %398, %401 : vector<2x128xf32>
    %c0_203 = arith.constant 0 : index
    %c0_204 = arith.constant 0 : index
    %c0_205 = arith.constant 0 : index
    %403 = vector.load %arg11[%c0_203, %c0_204, %c0_205] : memref<2x2x32xf32, #tpu.memory_space<vmem>>, vector<1x2x32xf32>
    %404 = vector.shape_cast %403 : vector<1x2x32xf32> to vector<2x32xf32>
    %405 = vector.extract_strided_slice %402 {offsets = [0, 0], sizes = [2, 96], strides = [1, 1]} : vector<2x128xf32> to vector<2x96xf32>
    %406 = arith.negf %405 : vector<2x96xf32>
    %407 = math.exp %406 : vector<2x96xf32>
    %cst_206 = arith.constant 1.000000e+00 : f32
    %408 = vector.broadcast %cst_206 : f32 to vector<2x96xf32>
    %409 = arith.addf %408, %407 : vector<2x96xf32>
    %410 = arith.divf %408, %409 : vector<2x96xf32>
    %411 = vector.extract_strided_slice %402 {offsets = [0, 96], sizes = [2, 32], strides = [1, 1]} : vector<2x128xf32> to vector<2x32xf32>
    %412 = math.tanh %411 : vector<2x32xf32>
    %413 = vector.extract_strided_slice %410 {offsets = [0, 0], sizes = [2, 32], strides = [1, 1]} : vector<2x96xf32> to vector<2x32xf32>
    %414 = vector.extract_strided_slice %410 {offsets = [0, 32], sizes = [2, 32], strides = [1, 1]} : vector<2x96xf32> to vector<2x32xf32>
    %415 = vector.extract_strided_slice %410 {offsets = [0, 64], sizes = [2, 32], strides = [1, 1]} : vector<2x96xf32> to vector<2x32xf32>
    %416 = arith.mulf %414, %404 : vector<2x32xf32>
    %417 = arith.mulf %413, %412 : vector<2x32xf32>
    %418 = arith.addf %416, %417 : vector<2x32xf32>
    %419 = math.tanh %418 : vector<2x32xf32>
    %420 = arith.mulf %415, %419 : vector<2x32xf32>
    %c0_207 = arith.constant 0 : index
    %c0_208 = arith.constant 0 : index
    %c0_209 = arith.constant 0 : index
    %421 = vector.load %arg10[%c0_207, %c0_208, %c0_209] : memref<2x2x32xf32, #tpu.memory_space<vmem>>, vector<1x2x32xf32>
    %422 = vector.shape_cast %421 : vector<1x2x32xf32> to vector<2x32xf32>
    %423 = vector.shape_cast %420 : vector<2x32xf32> to vector<1x2x32xf32>
    tpu.vector_store %arg10[%c0_207, %c0_208, %c0_209], %423 {strides = array<i32>} : memref<2x2x32xf32, #tpu.memory_space<vmem>>, vector<1x2x32xf32>,
    %c0_210 = arith.constant 0 : index
    %c0_211 = arith.constant 0 : index
    %c0_212 = arith.constant 0 : index
    %424 = vector.load %arg11[%c0_210, %c0_211, %c0_212] : memref<2x2x32xf32, #tpu.memory_space<vmem>>, vector<1x2x32xf32>
    %425 = vector.shape_cast %424 : vector<1x2x32xf32> to vector<2x32xf32>
    %426 = vector.shape_cast %418 : vector<2x32xf32> to vector<1x2x32xf32>
    tpu.vector_store %arg11[%c0_210, %c0_211, %c0_212], %426 {strides = array<i32>} : memref<2x2x32xf32, #tpu.memory_space<vmem>>, vector<1x2x32xf32>,
    %c1_213 = arith.constant 1 : index
    %c0_214 = arith.constant 0 : index
    %c0_215 = arith.constant 0 : index
    %427 = vector.load %arg10[%c1_213, %c0_214, %c0_215] : memref<2x2x32xf32, #tpu.memory_space<vmem>>, vector<1x2x32xf32>
    %428 = vector.shape_cast %427 : vector<1x2x32xf32> to vector<2x32xf32>
    %429 = tpu.concatenate %420, %428 in 1 : vector<2x32xf32>, vector<2x32xf32> -> vector<2x64xf32>
    %cst_216 = arith.constant dense<0.000000e+00> : vector<2x128xf32>
    %430 = tpu.matmul %429, %4, %cst_216 {dimension_numbers = #tpu.dot_dimension_numbers<[1], [0], [0], [1], [0, 0, 1, 1], [], []>} : vector<2x64xf32>, vector<64x128xf32>, vector<2x128xf32> -> vector<2x128xf32>
    %431 = vector.broadcast %5 : vector<1x128xf32> to vector<2x128xf32>
    %432 = arith.addf %430, %431 : vector<2x128xf32>
    %c1_217 = arith.constant 1 : index
    %c0_218 = arith.constant 0 : index
    %c0_219 = arith.constant 0 : index
    %433 = vector.load %arg11[%c1_217, %c0_218, %c0_219] : memref<2x2x32xf32, #tpu.memory_space<vmem>>, vector<1x2x32xf32>
    %434 = vector.shape_cast %433 : vector<1x2x32xf32> to vector<2x32xf32>
    %435 = vector.extract_strided_slice %432 {offsets = [0, 0], sizes = [2, 96], strides = [1, 1]} : vector<2x128xf32> to vector<2x96xf32>
    %436 = arith.negf %435 : vector<2x96xf32>
    %437 = math.exp %436 : vector<2x96xf32>
    %cst_220 = arith.constant 1.000000e+00 : f32
    %438 = vector.broadcast %cst_220 : f32 to vector<2x96xf32>
    %439 = arith.addf %438, %437 : vector<2x96xf32>
    %440 = arith.divf %438, %439 : vector<2x96xf32>
    %441 = vector.extract_strided_slice %432 {offsets = [0, 96], sizes = [2, 32], strides = [1, 1]} : vector<2x128xf32> to vector<2x32xf32>
    %442 = math.tanh %441 : vector<2x32xf32>
    %443 = vector.extract_strided_slice %440 {offsets = [0, 0], sizes = [2, 32], strides = [1, 1]} : vector<2x96xf32> to vector<2x32xf32>
    %444 = vector.extract_strided_slice %440 {offsets = [0, 32], sizes = [2, 32], strides = [1, 1]} : vector<2x96xf32> to vector<2x32xf32>
    %445 = vector.extract_strided_slice %440 {offsets = [0, 64], sizes = [2, 32], strides = [1, 1]} : vector<2x96xf32> to vector<2x32xf32>
    %446 = arith.mulf %444, %434 : vector<2x32xf32>
    %447 = arith.mulf %443, %442 : vector<2x32xf32>
    %448 = arith.addf %446, %447 : vector<2x32xf32>
    %449 = math.tanh %448 : vector<2x32xf32>
    %450 = arith.mulf %445, %449 : vector<2x32xf32>
    %c1_221 = arith.constant 1 : index
    %c0_222 = arith.constant 0 : index
    %c0_223 = arith.constant 0 : index
    %451 = vector.load %arg10[%c1_221, %c0_222, %c0_223] : memref<2x2x32xf32, #tpu.memory_space<vmem>>, vector<1x2x32xf32>
    %452 = vector.shape_cast %451 : vector<1x2x32xf32> to vector<2x32xf32>
    %453 = vector.shape_cast %450 : vector<2x32xf32> to vector<1x2x32xf32>
    tpu.vector_store %arg10[%c1_221, %c0_222, %c0_223], %453 {strides = array<i32>} : memref<2x2x32xf32, #tpu.memory_space<vmem>>, vector<1x2x32xf32>,
    %c1_224 = arith.constant 1 : index
    %c0_225 = arith.constant 0 : index
    %c0_226 = arith.constant 0 : index
    %454 = vector.load %arg11[%c1_224, %c0_225, %c0_226] : memref<2x2x32xf32, #tpu.memory_space<vmem>>, vector<1x2x32xf32>
    %455 = vector.shape_cast %454 : vector<1x2x32xf32> to vector<2x32xf32>
    %456 = vector.shape_cast %448 : vector<2x32xf32> to vector<1x2x32xf32>
    tpu.vector_store %arg11[%c1_224, %c0_225, %c0_226], %456 {strides = array<i32>} : memref<2x2x32xf32, #tpu.memory_space<vmem>>, vector<1x2x32xf32>,
    %457 = arith.index_cast %c6_i32 : i32 to index
    %c0_227 = arith.constant 0 : index
    %c0_228 = arith.constant 0 : index
    %458 = vector.load %arg7[%457, %c0_227, %c0_228] : memref<8x2x32xf32, #tpu.memory_space<vmem>>, vector<1x2x32xf32>
    %459 = vector.shape_cast %458 : vector<1x2x32xf32> to vector<2x32xf32>
    %460 = vector.shape_cast %450 : vector<2x32xf32> to vector<1x2x32xf32>
    tpu.vector_store %arg7[%457, %c0_227, %c0_228], %460 {strides = array<i32>} : memref<8x2x32xf32, #tpu.memory_space<vmem>>, vector<1x2x32xf32>,
    %c7_i32 = arith.constant 7 : i32
    %461 = arith.index_cast %c7_i32 : i32 to index
    %c0_229 = arith.constant 0 : index
    %c0_230 = arith.constant 0 : index
    %462 = vector.load %arg1[%461, %c0_229, %c0_230] : memref<8x2x128xf32, #tpu.memory_space<vmem>>, vector<1x2x128xf32>
    %463 = vector.shape_cast %462 : vector<1x2x128xf32> to vector<2x128xf32>
    %c0_231 = arith.constant 0 : index
    %c0_232 = arith.constant 0 : index
    %c0_233 = arith.constant 0 : index
    %464 = vector.load %arg10[%c0_231, %c0_232, %c0_233] : memref<2x2x32xf32, #tpu.memory_space<vmem>>, vector<1x2x32xf32>
    %465 = vector.shape_cast %464 : vector<1x2x32xf32> to vector<2x32xf32>
    %cst_234 = arith.constant dense<0.000000e+00> : vector<2x128xf32>
    %466 = tpu.matmul %465, %3, %cst_234 {dimension_numbers = #tpu.dot_dimension_numbers<[1], [0], [0], [1], [0, 0, 1, 1], [], []>} : vector<2x32xf32>, vector<32x128xf32>, vector<2x128xf32> -> vector<2x128xf32>
    %467 = arith.addf %463, %466 : vector<2x128xf32>
    %c0_235 = arith.constant 0 : index
    %c0_236 = arith.constant 0 : index
    %c0_237 = arith.constant 0 : index
    %468 = vector.load %arg11[%c0_235, %c0_236, %c0_237] : memref<2x2x32xf32, #tpu.memory_space<vmem>>, vector<1x2x32xf32>
    %469 = vector.shape_cast %468 : vector<1x2x32xf32> to vector<2x32xf32>
    %470 = vector.extract_strided_slice %467 {offsets = [0, 0], sizes = [2, 96], strides = [1, 1]} : vector<2x128xf32> to vector<2x96xf32>
    %471 = arith.negf %470 : vector<2x96xf32>
    %472 = math.exp %471 : vector<2x96xf32>
    %cst_238 = arith.constant 1.000000e+00 : f32
    %473 = vector.broadcast %cst_238 : f32 to vector<2x96xf32>
    %474 = arith.addf %473, %472 : vector<2x96xf32>
    %475 = arith.divf %473, %474 : vector<2x96xf32>
    %476 = vector.extract_strided_slice %467 {offsets = [0, 96], sizes = [2, 32], strides = [1, 1]} : vector<2x128xf32> to vector<2x32xf32>
    %477 = math.tanh %476 : vector<2x32xf32>
    %478 = vector.extract_strided_slice %475 {offsets = [0, 0], sizes = [2, 32], strides = [1, 1]} : vector<2x96xf32> to vector<2x32xf32>
    %479 = vector.extract_strided_slice %475 {offsets = [0, 32], sizes = [2, 32], strides = [1, 1]} : vector<2x96xf32> to vector<2x32xf32>
    %480 = vector.extract_strided_slice %475 {offsets = [0, 64], sizes = [2, 32], strides = [1, 1]} : vector<2x96xf32> to vector<2x32xf32>
    %481 = arith.mulf %479, %469 : vector<2x32xf32>
    %482 = arith.mulf %478, %477 : vector<2x32xf32>
    %483 = arith.addf %481, %482 : vector<2x32xf32>
    %484 = math.tanh %483 : vector<2x32xf32>
    %485 = arith.mulf %480, %484 : vector<2x32xf32>
    %c0_239 = arith.constant 0 : index
    %c0_240 = arith.constant 0 : index
    %c0_241 = arith.constant 0 : index
    %486 = vector.load %arg10[%c0_239, %c0_240, %c0_241] : memref<2x2x32xf32, #tpu.memory_space<vmem>>, vector<1x2x32xf32>
    %487 = vector.shape_cast %486 : vector<1x2x32xf32> to vector<2x32xf32>
    %488 = vector.shape_cast %485 : vector<2x32xf32> to vector<1x2x32xf32>
    tpu.vector_store %arg10[%c0_239, %c0_240, %c0_241], %488 {strides = array<i32>} : memref<2x2x32xf32, #tpu.memory_space<vmem>>, vector<1x2x32xf32>,
    %c0_242 = arith.constant 0 : index
    %c0_243 = arith.constant 0 : index
    %c0_244 = arith.constant 0 : index
    %489 = vector.load %arg11[%c0_242, %c0_243, %c0_244] : memref<2x2x32xf32, #tpu.memory_space<vmem>>, vector<1x2x32xf32>
    %490 = vector.shape_cast %489 : vector<1x2x32xf32> to vector<2x32xf32>
    %491 = vector.shape_cast %483 : vector<2x32xf32> to vector<1x2x32xf32>
    tpu.vector_store %arg11[%c0_242, %c0_243, %c0_244], %491 {strides = array<i32>} : memref<2x2x32xf32, #tpu.memory_space<vmem>>, vector<1x2x32xf32>,
    %c1_245 = arith.constant 1 : index
    %c0_246 = arith.constant 0 : index
    %c0_247 = arith.constant 0 : index
    %492 = vector.load %arg10[%c1_245, %c0_246, %c0_247] : memref<2x2x32xf32, #tpu.memory_space<vmem>>, vector<1x2x32xf32>
    %493 = vector.shape_cast %492 : vector<1x2x32xf32> to vector<2x32xf32>
    %494 = tpu.concatenate %485, %493 in 1 : vector<2x32xf32>, vector<2x32xf32> -> vector<2x64xf32>
    %cst_248 = arith.constant dense<0.000000e+00> : vector<2x128xf32>
    %495 = tpu.matmul %494, %4, %cst_248 {dimension_numbers = #tpu.dot_dimension_numbers<[1], [0], [0], [1], [0, 0, 1, 1], [], []>} : vector<2x64xf32>, vector<64x128xf32>, vector<2x128xf32> -> vector<2x128xf32>
    %496 = vector.broadcast %5 : vector<1x128xf32> to vector<2x128xf32>
    %497 = arith.addf %495, %496 : vector<2x128xf32>
    %c1_249 = arith.constant 1 : index
    %c0_250 = arith.constant 0 : index
    %c0_251 = arith.constant 0 : index
    %498 = vector.load %arg11[%c1_249, %c0_250, %c0_251] : memref<2x2x32xf32, #tpu.memory_space<vmem>>, vector<1x2x32xf32>
    %499 = vector.shape_cast %498 : vector<1x2x32xf32> to vector<2x32xf32>
    %500 = vector.extract_strided_slice %497 {offsets = [0, 0], sizes = [2, 96], strides = [1, 1]} : vector<2x128xf32> to vector<2x96xf32>
    %501 = arith.negf %500 : vector<2x96xf32>
    %502 = math.exp %501 : vector<2x96xf32>
    %cst_252 = arith.constant 1.000000e+00 : f32
    %503 = vector.broadcast %cst_252 : f32 to vector<2x96xf32>
    %504 = arith.addf %503, %502 : vector<2x96xf32>
    %505 = arith.divf %503, %504 : vector<2x96xf32>
    %506 = vector.extract_strided_slice %497 {offsets = [0, 96], sizes = [2, 32], strides = [1, 1]} : vector<2x128xf32> to vector<2x32xf32>
    %507 = math.tanh %506 : vector<2x32xf32>
    %508 = vector.extract_strided_slice %505 {offsets = [0, 0], sizes = [2, 32], strides = [1, 1]} : vector<2x96xf32> to vector<2x32xf32>
    %509 = vector.extract_strided_slice %505 {offsets = [0, 32], sizes = [2, 32], strides = [1, 1]} : vector<2x96xf32> to vector<2x32xf32>
    %510 = vector.extract_strided_slice %505 {offsets = [0, 64], sizes = [2, 32], strides = [1, 1]} : vector<2x96xf32> to vector<2x32xf32>
    %511 = arith.mulf %509, %499 : vector<2x32xf32>
    %512 = arith.mulf %508, %507 : vector<2x32xf32>
    %513 = arith.addf %511, %512 : vector<2x32xf32>
    %514 = math.tanh %513 : vector<2x32xf32>
    %515 = arith.mulf %510, %514 : vector<2x32xf32>
    %c1_253 = arith.constant 1 : index
    %c0_254 = arith.constant 0 : index
    %c0_255 = arith.constant 0 : index
    %516 = vector.load %arg10[%c1_253, %c0_254, %c0_255] : memref<2x2x32xf32, #tpu.memory_space<vmem>>, vector<1x2x32xf32>
    %517 = vector.shape_cast %516 : vector<1x2x32xf32> to vector<2x32xf32>
    %518 = vector.shape_cast %515 : vector<2x32xf32> to vector<1x2x32xf32>
    tpu.vector_store %arg10[%c1_253, %c0_254, %c0_255], %518 {strides = array<i32>} : memref<2x2x32xf32, #tpu.memory_space<vmem>>, vector<1x2x32xf32>,
    %c1_256 = arith.constant 1 : index
    %c0_257 = arith.constant 0 : index
    %c0_258 = arith.constant 0 : index
    %519 = vector.load %arg11[%c1_256, %c0_257, %c0_258] : memref<2x2x32xf32, #tpu.memory_space<vmem>>, vector<1x2x32xf32>
    %520 = vector.shape_cast %519 : vector<1x2x32xf32> to vector<2x32xf32>
    %521 = vector.shape_cast %513 : vector<2x32xf32> to vector<1x2x32xf32>
    tpu.vector_store %arg11[%c1_256, %c0_257, %c0_258], %521 {strides = array<i32>} : memref<2x2x32xf32, #tpu.memory_space<vmem>>, vector<1x2x32xf32>,
    %522 = arith.index_cast %c7_i32 : i32 to index
    %c0_259 = arith.constant 0 : index
    %c0_260 = arith.constant 0 : index
    %523 = vector.load %arg7[%522, %c0_259, %c0_260] : memref<8x2x32xf32, #tpu.memory_space<vmem>>, vector<1x2x32xf32>
    %524 = vector.shape_cast %523 : vector<1x2x32xf32> to vector<2x32xf32>
    %525 = vector.shape_cast %515 : vector<2x32xf32> to vector<1x2x32xf32>
    tpu.vector_store %arg7[%522, %c0_259, %c0_260], %525 {strides = array<i32>} : memref<8x2x32xf32, #tpu.memory_space<vmem>>, vector<1x2x32xf32>,
    %c8_i32 = arith.constant 8 : i32
    %c0_i32_261 = arith.constant 0 : i32
    %526 = arith.cmpi eq, %arg0, %c0_i32_261 : i32
    %527 = arith.extui %526 : i1 to i32
    %c0_i32_262 = arith.constant 0 : i32
    %528 = arith.cmpi ne, %527, %c0_i32_262 : i32
    scf.if %528 {
      %c0_263 = arith.constant 0 : index
      %c0_264 = arith.constant 0 : index
      %c0_265 = arith.constant 0 : index
      %529 = vector.load %arg10[%c0_263, %c0_264, %c0_265] : memref<2x2x32xf32, #tpu.memory_space<vmem>>, vector<2x2x32xf32>
      %c0_266 = arith.constant 0 : index
      %c0_267 = arith.constant 0 : index
      %c0_268 = arith.constant 0 : index
      %530 = vector.load %arg8[%c0_266, %c0_267, %c0_268] : memref<2x2x32xf32, #tpu.memory_space<vmem>>, vector<2x2x32xf32>
      tpu.vector_store %arg8[%c0_266, %c0_267, %c0_268], %529 {strides = array<i32>} : memref<2x2x32xf32, #tpu.memory_space<vmem>>, vector<2x2x32xf32>,
      %c0_269 = arith.constant 0 : index
      %c0_270 = arith.constant 0 : index
      %c0_271 = arith.constant 0 : index
      %531 = vector.load %arg11[%c0_269, %c0_270, %c0_271] : memref<2x2x32xf32, #tpu.memory_space<vmem>>, vector<2x2x32xf32>
      %c0_272 = arith.constant 0 : index
      %c0_273 = arith.constant 0 : index
      %c0_274 = arith.constant 0 : index
      %532 = vector.load %arg9[%c0_272, %c0_273, %c0_274] : memref<2x2x32xf32, #tpu.memory_space<vmem>>, vector<2x2x32xf32>
      tpu.vector_store %arg9[%c0_272, %c0_273, %c0_274], %531 {strides = array<i32>} : memref<2x2x32xf32, #tpu.memory_space<vmem>>, vector<2x2x32xf32>,
    } else {
    }
    return
  }
  func.func @transform_0(%arg0: i32) -> (i32, i32, i32) {
    %c0_i32 = arith.constant 0 : i32
    %c0_i32_0 = arith.constant 0 : i32
    %c0_i32_1 = arith.constant 0 : i32
    return %arg0, %c0_i32, %c0_i32_0 : i32, i32, i32
  }
  func.func @transform_1(%arg0: i32) -> (i32, i32, i32) {
    %c0_i32 = arith.constant 0 : i32
    %c0_i32_0 = arith.constant 0 : i32
    %c0_i32_1 = arith.constant 0 : i32
    %c0_i32_2 = arith.constant 0 : i32
    return %c0_i32, %c0_i32_0, %c0_i32_1 : i32, i32, i32
  }
  func.func @transform_2(%arg0: i32) -> (i32, i32, i32) {
    %c0_i32 = arith.constant 0 : i32
    %c0_i32_0 = arith.constant 0 : i32
    %c0_i32_1 = arith.constant 0 : i32
    %c0_i32_2 = arith.constant 0 : i32
    return %c0_i32, %c0_i32_0, %c0_i32_1 : i32, i32, i32
  }
  func.func @transform_3(%arg0: i32) -> (i32, i32) {
    %c0_i32 = arith.constant 0 : i32
    %c0_i32_0 = arith.constant 0 : i32
    %c0_i32_1 = arith.constant 0 : i32
    return %c0_i32, %c0_i32_0 : i32, i32
  }
  func.func @transform_4(%arg0: i32) -> (i32, i32) {
    %c0_i32 = arith.constant 0 : i32
    %c0_i32_0 = arith.constant 0 : i32
    %c0_i32_1 = arith.constant 0 : i32
    return %c0_i32, %c0_i32_0 : i32, i32
  }
  func.func @transform_5(%arg0: i32) -> (i32, i32) {
    %c0_i32 = arith.constant 0 : i32
    %c0_i32_0 = arith.constant 0 : i32
    %c0_i32_1 = arith.constant 0 : i32
    return %c0_i32, %c0_i32_0 : i32, i32
  }
  func.func @transform_6(%arg0: i32) -> (i32, i32, i32) {
    %c0_i32 = arith.constant 0 : i32
    %c0_i32_0 = arith.constant 0 : i32
    %c0_i32_1 = arith.constant 0 : i32
    return %arg0, %c0_i32, %c0_i32_0 : i32, i32, i32
  }
  func.func @transform_7(%arg0: i32) -> (i32, i32, i32) {
    %c0_i32 = arith.constant 0 : i32
    %c0_i32_0 = arith.constant 0 : i32
    %c0_i32_1 = arith.constant 0 : i32
    %c0_i32_2 = arith.constant 0 : i32
    return %c0_i32, %c0_i32_0, %c0_i32_1 : i32, i32, i32
  }
  func.func @transform_8(%arg0: i32) -> (i32, i32, i32) {
    %c0_i32 = arith.constant 0 : i32
    %c0_i32_0 = arith.constant 0 : i32
    %c0_i32_1 = arith.constant 0 : i32
    %c0_i32_2 = arith.constant 0 : i32
    return %c0_i32, %c0_i32_0, %c0_i32_1 : i32, i32, i32
  }
}

</mosaic_0001>

<bundles_post_ra>
// kernel: tpu_custom_call.1
= control target key start
LH: loop header
LB: loop body
LE: loop exit
PB: predicated region body
PF: predicated region fallthrough
CT: control target
= control target key end

     0   :  { %14 = vsyncpa [#allocation5], 0  ;;  %s2294_s0 = inlined_call_operand.hbm [shape: f32[8,2,128], index: 0, kind: input, shape index: {}]   ;;  %s2295_s1 = inlined_call_operand.hbm [shape: f32[2,2,32], index: 1, kind: input, shape index: {}]   ;;  %s2296_s2 = inlined_call_operand.hbm [shape: f32[2,2,32], index: 2, kind: input, shape index: {}]   ;;  %s2297_s3 = inlined_call_operand.hbm [shape: f32[32,128], index: 3, kind: input, shape index: {}]   ;;  %s2298_s4 = inlined_call_operand.hbm [shape: f32[64,128], index: 4, kind: input, shape index: {}]   ;;  %s2299_s5 = inlined_call_operand.vmem [shape: f32[1,128], index: 5, kind: input, shape index: {}]   ;;  %s2300_s6 = inlined_call_operand.hbm [shape: f32[8,2,32], index: 6, kind: output, shape index: {0}]   ;;  %s2301_s7 = inlined_call_operand.hbm [shape: f32[2,2,32], index: 7, kind: output, shape index: {1}]   ;;  %s2302_s8 = inlined_call_operand.hbm [shape: f32[2,2,32], index: 8, kind: output, shape index: {2}]  }
   0x1   :  { %15 = vsyncpa [#allocation8], 0 }
   0x2   :  { %16 = vsyncpa [#allocation11], 0 }
   0x3   :  { %17 = vsyncpa [#allocation6], 0 }
   0x4   :  { %18 = vsyncpa [#allocation15], 0  ;;  %s36_s29 = sshll.u32 %s2295_s1, 4  ;;  %s1879_s30 = smov [#allocation7]   ;;  %s37_s29 = int_to_ptr.hbm [resolvable:$true] %s36_s29 }
   0x5   :  { %s38_s9 = sshll.u32 %s1879_s30, 4  ;;  %s62_s12 = sshll.u32 %s2297_s3, 4  ;;  %s39_s9 = int_to_ptr.vmem [resolvable:$true] %s38_s9  ;;  %s63_s12 = int_to_ptr.hbm [resolvable:$true] %s62_s12 }
   0x6   :  { %s1880_s13 = smov 32   ;;  %s1881_s14 = smov 2  }
   0x7   :  { %44 = dma.hbm_to_vmem [thread:$0]  %s37_s29, 64, %s39_s9, [#allocation8], %s1880_s13, %s1880_s13, %s1881_s14  }
   0x8   :  { %s1882_s15 = smov [#allocation10]   ;;  %s1883_s17 = smov 128  }
   0x9   :  { %s64_s16 = sshll.u32 %s1882_s15, 4  ;;  %s1884_s1 = smov 8   ;;  %s65_s16 = int_to_ptr.vmem [resolvable:$true] %s64_s16 }
   0xa   :  { %70 = dma.hbm_to_vmem [thread:$0]  %s63_s12, 512, %s65_s16, [#allocation11], %s1883_s17, %s1883_s17, %s1884_s1  }
   0xb   :  { %s23_s20 = sshll.u32 %s2294_s0, 4  ;;  %s1885_s21 = smov [#allocation4]   ;;  %s24_s20 = int_to_ptr.hbm [resolvable:$true] %s23_s20 }
   0xc   :  { %s25_s3 = sshll.u32 %s1885_s21, 4  ;;  %s49_s24 = sshll.u32 %s2296_s2, 4  ;;  %s26_s3 = int_to_ptr.vmem [resolvable:$true] %s25_s3  ;;  %s50_s24 = int_to_ptr.hbm [resolvable:$true] %s49_s24 }
   0xd   :  { %31 = dma.hbm_to_vmem [thread:$0]  %s24_s20, 256, %s26_s3, [#allocation5], %s1880_s13, %s1880_s13, %s1881_s14  }
   0xe   :  { %s1886_s25 = smov [#allocation9]   ;;  %s75_s29 = sshll.u32 %s2298_s4, 4  ;;  %s76_s29 = int_to_ptr.hbm [resolvable:$true] %s75_s29 }
   0xf   :  { %s51_s26 = sshll.u32 %s1886_s25, 4  ;;  %s1887_s0 = smov [#allocation12]   ;;  %s52_s26 = int_to_ptr.vmem [resolvable:$true] %s51_s26 }
  0x10   :  { %57 = dma.hbm_to_vmem [thread:$0]  %s50_s24, 64, %s52_s26, [#allocation8], %s1880_s13, %s1880_s13, %s1881_s14  }
  0x11   :  { %s77_s30 = sshll.u32 %s1887_s0, 4  ;;  %s78_s30 = int_to_ptr.vmem [resolvable:$true] %s77_s30 }
  0x12   :  { %83 = dma.hbm_to_vmem [thread:$0]  %s76_s29, 1024, %s78_s30, [#allocation11], %s1883_s17, %s1883_s17, %s1884_s1  }
  0x13   :  { %1869 = dma.done.wait [#allocation5], 256  }
  0x14   :  { %1870 = vsyncadd [#allocation5], 4294967040 }
  0x15   :  { %1871 = dma.done.wait [#allocation8], 128  }
  0x16   :  { %1872 = vsyncadd [#allocation8], 4294967168 }
  0x17   :  { %1873 = dma.done.wait [#allocation11], 1536  }
  0x18   :  { %1874 = vsyncadd [#allocation11], 4294965760  ;;  %vm112_vm0 = vcmask 254976   ;;  %v1962_v0 = vld [vmem:[#allocation10 + $0x18] sm:$0xff]  ;;  %v1964_v1 = vld [vmem:[#allocation10 + $0x10] sm:$0xff]  ;;  %vm134_vm1 = vcmask 261120  }
  0x19   :  { %150 = vmatpush.msra.mxu0 %v1962_v0  ;;  %v110_v2 = vld [vmem:[#allocation7] sm:$0x3]  ;;  %318 = vmatpush.msra.mxu2 %v1962_v0  ;;  %v1968_v3 = vld [vmem:[#allocation10 + $0x8] sm:$0xff]  ;;  %v1973_v4 = vld [vmem:[#allocation10] sm:$0xff]  ;;  %s1888_s2 = smov 96   ;;  %s1889_s4 = smov 64  }
  0x1a   :  { %113 = vst.msk [vmem:[#allocation2] sm:$0x3] %vm112_vm0, %v110_v2  ;;  %v115_v6 = vld [vmem:[#allocation9] sm:$0x3]  ;;  %v132_v7 = vld [vmem:[#allocation4] sm:$0x3] }
  0x1b   :  { %151 = vmatpush.msra.mxu0 %v1964_v1  ;;  %319 = vmatpush.msra.mxu2 %v1964_v1  ;;  %117 = vst.msk [vmem:[#allocation3] sm:$0x3] %vm112_vm0, %v115_v6  ;;  %v111_v32 = vld [vmem:[#allocation7 + $0x2] sm:$0x3]  ;;  %v116_v33 = vld [vmem:[#allocation9 + $0x2] sm:$0x3] }
  0x1c   :  { %114 = vst.msk [vmem:[#allocation2 + $0x2] sm:$0x3] %vm112_vm0, %v111_v32  ;;  %v1996_v34 = vld [vmem:[#allocation12 + $0x38] sm:$0xff]  ;;  %v1998_v35 = vld [vmem:[#allocation12 + $0x30] sm:$0xff]  ;;  %v2002_v36 = vld [vmem:[#allocation12 + $0x28] sm:$0xff]  ;;  %vm222_vm6 = vcmask 523264  }
  0x1d   :  { %152 = vmatpush.msra.mxu0 %v1968_v3  ;;  %320 = vmatpush.msra.mxu2 %v1968_v3  ;;  %118 = vst.msk [vmem:[#allocation3 + $0x2] sm:$0x3] %vm112_vm0, %v116_v33  ;;  %v2016_v43 = vld [vmem:[#allocation12 + $0x20] sm:$0xff]  ;;  %v2019_v44 = vld [vmem:[#allocation12 + $0x18] sm:$0xff]  ;;  %v2022_v45 = vld [vmem:[#allocation12 + $0x10] sm:$0xff]  ;;  %s1451_s1 = sshll.u32 %s2300_s6, 4  ;;  %s1452_s1 = int_to_ptr.hbm [resolvable:$true] %s1451_s1 }
  0x1e   :  { %234 = vmatpush.msra.mxu1 %v1996_v34  ;;  %396 = vmatpush.msra.mxu3 %v1996_v34  ;;  %v2027_v46 = vld [vmem:[#allocation12 + $0x8] sm:$0xff]  ;;  %v2035_v47 = vld [vmem:[#allocation12] sm:$0xff]  ;;  %s1891_s18 = smov [#allocation14]   ;;  %s1464_s3 = sshll.u32 %s2301_s7, 4  ;;  %s1465_s3 = int_to_ptr.hbm [resolvable:$true] %s1464_s3 }
  0x1f   :  { %153 = vmatpush.msra.mxu0 %v1973_v4  ;;  %321 = vmatpush.msra.mxu2 %v1973_v4  ;;  %v2072_v52 = vld [vmem:[%s2299_s5] ss:$0 sm:$0xff]  ;;  %v301_v55 = vld [vmem:[#allocation4 + $0x2] sm:$0x3]  ;;  %s1462_s19 = sshll.u32 %s1891_s18, 4  ;;  %s1892_s22 = smov [#allocation16]   ;;  %s1463_s19 = int_to_ptr.vmem [resolvable:$true] %s1462_s19 }
  0x20   :  { %235 = vmatpush.msra.mxu1 %v1998_v35  ;;  %397 = vmatpush.msra.mxu3 %v1998_v35  ;;  %s1475_s23 = sshll.u32 %s1892_s22, 4  ;;  %s1477_s25 = sshll.u32 %s2302_s8, 4  ;;  %s1476_s23 = int_to_ptr.vmem [resolvable:$true] %s1475_s23  ;;  %s1478_s25 = int_to_ptr.hbm [resolvable:$true] %s1477_s25 }
  0x21   :  { %480 = vmatpush.msrb.mxu0 %v1962_v0  ;;  %v133_v5 = vld [vmem:[#allocation2] sm:$0x3]  ;;  %558 = vmatpush.msrb.mxu2 %v1996_v34 }
  0x22   :  { %1501 = vmatmul.msk.f32.vlgmr.msra.gmra.mxu0 %vm134_vm1, %v133_v5  ;;  %v159_v11 = vld [vmem:[#allocation3] sm:$0x3]  ;;  %236 = vmatpush.msra.mxu1 %v2002_v36 }
  0x23   :  { %481 = vmatpush.msrb.mxu0 %v1964_v1  ;;  %559 = vmatpush.msrb.mxu2 %v1998_v35  ;;  %v213_v40 = vld [vmem:[#allocation2 + $0x2] sm:$0x3] }
  0x24   :  { %398 = vmatpush.msra.mxu3 %v2002_v36  ;;  %v247_v41 = vld [vmem:[#allocation3 + $0x2] sm:$0x3]  ;;  %237 = vmatpush.msra.mxu1 %v2016_v43 }
  0x25   :  { %482 = vmatpush.msrb.mxu0 %v1968_v3  ;;  %560 = vmatpush.msrb.mxu2 %v2002_v36 }
  0x26   :  { %399 = vmatpush.msra.mxu3 %v2016_v43  ;;  %238 = vmatpush.msra.mxu1 %v2019_v44 }
  0x27   :  { %483 = vmatpush.msrb.mxu0 %v1973_v4  ;;  %561 = vmatpush.msrb.mxu2 %v2016_v43 }
  0x28   :  { %400 = vmatpush.msra.mxu3 %v2019_v44  ;;  %239 = vmatpush.msra.mxu1 %v2022_v45 }
  0x29   :  { %642 = vmatpush.msra.mxu0 %v1962_v0  ;;  %562 = vmatpush.msrb.mxu2 %v2019_v44 }
  0x2a   :  { %401 = vmatpush.msra.mxu3 %v2022_v45  ;;  %240 = vmatpush.msra.mxu1 %v2027_v46 }
  0x2b   :  { %643 = vmatpush.msra.mxu0 %v1964_v1  ;;  %563 = vmatpush.msrb.mxu2 %v2022_v45 }
  0x2c   :  { %402 = vmatpush.msra.mxu3 %v2027_v46  ;;  %241 = vmatpush.msra.mxu1 %v2035_v47 }
  0x2d   :  { %644 = vmatpush.msra.mxu0 %v1968_v3  ;;  %564 = vmatpush.msrb.mxu2 %v2027_v46 }
  0x2e   :  { %403 = vmatpush.msra.mxu3 %v2035_v47  ;;  %720 = vmatpush.msrb.mxu1 %v1996_v34 }
  0x2f   :  { %645 = vmatpush.msra.mxu0 %v1973_v4  ;;  %565 = vmatpush.msrb.mxu2 %v2035_v47 }
  0x30   :  { %804 = vmatpush.msrb.mxu3 %v1962_v0  ;;  %721 = vmatpush.msrb.mxu1 %v1998_v35 }
  0x32   :  { %805 = vmatpush.msrb.mxu3 %v1964_v1  ;;  %722 = vmatpush.msrb.mxu1 %v2002_v36 }
  0x34   :  { %806 = vmatpush.msrb.mxu3 %v1968_v3  ;;  %723 = vmatpush.msrb.mxu1 %v2016_v43 }
  0x36   :  { %807 = vmatpush.msrb.mxu3 %v1973_v4  ;;  %724 = vmatpush.msrb.mxu1 %v2019_v44 }
  0x38   :  { %725 = vmatpush.msrb.mxu1 %v2022_v45 }
  0x3a   :  { %726 = vmatpush.msrb.mxu1 %v2027_v46 }
  0x3c   :  { %727 = vmatpush.msrb.mxu1 %v2035_v47 }
  0x9f   :  { %v155_v8 = vpop.f32.mrf.mxu0 }
  0xa0   :  { %v158_v9 = vadd.f32 %v155_v8, %v132_v7 }
  0xa2   :  { %1548 = vtanh.f32 %v158_v9  ;;  %v1502_v12 = vmul.f32 -1.442695, %v158_v9 }
  0xa4   :  { %1550 = vpow2.f32 %v1502_v12 }
  0xa8   :  { %v1549_v10 = vpop.eup %1548 }
  0xa9   :  { %186 = vrot.lane.b32.xlu0 %v1549_v10, %s1880_s13 }
  0xaa   :  { %v1551_v13 = vpop.eup %1550 }
  0xab   :  { %v163_v14 = vadd.f32 1.0, %v1551_v13 }
  0xad   :  { %1552 = vrcp.f32 %v163_v14  ;;  %v175_v20 = vand.u32 2147483648, %v163_v14  ;;  %vm169_vm3 = vweird.f32 %v163_v14  ;;  %v173_v21 = vand.u32 2147483647, %v163_v14 }
  0xaf   :  { %v176_v23 = vor.u32 1.1754944e-38, %v175_v20  ;;  %vm174_vm5 = vcmp.eq.f32.partialorder %v173_v21, 8.507059e+37 }
  0xb1   :  { %181 = vrot.lane.b32.xlu0 %v159_v11, %s1880_s13 }
  0xb3   :  { %v1553_v15 = vpop.eup %1552 }
  0xb4   :  { %v165_v16 = vmul.f32 %v1553_v15, %v163_v14  ;;  %vm170_vm2 = vweird.f32 %v1553_v15 }
  0xb5   :  { %vm171_vm4 = vmor %vm169_vm3, %vm170_vm2 }
  0xb6   :  { %v166_v17 = vsub.f32 1.0, %v165_v16 }
  0xb8   :  { %v167_v18 = vmul.f32 %v1553_v15, %v166_v17 }
  0xba   :  { %v168_v19 = vadd.f32 %v1553_v15, %v167_v18 }
  0xbc   :  { %v172_v22 = vsel %vm171_vm4, %v1553_v15, %v168_v19 }
  0xbd   :  { %v177_v25 = vsel %vm174_vm5, %v176_v23, %v172_v22 }
 0x11b   :  { %v187_v24 = vpop.permute.xlu0 %186 }
 0x11c   :  { %v189_v26 = vmul.f32 %v187_v24, %v177_v25 }
 0x11e   :  { %191 = vrot.lane.b32.xlu1 %v189_v26, %s1880_s13 }
 0x123   :  { %v182_v27 = vpop.permute.xlu0 %181 }
 0x124   :  { %v184_v28 = vmul.f32 %v182_v27, %v177_v25 }
 0x190   :  { %v192_v29 = vpop.permute.xlu1 %191 }
 0x191   :  { %v194_v30 = vadd.f32 %v192_v29, %v184_v28 }
 0x193   :  { %1554 = vtanh.f32 %v194_v30 }
 0x199   :  { %v1555_v31 = vpop.eup %1554 }
 0x19a   :  { %197 = vrot.lane.b32.xlu1 %v1555_v31, %s1880_s13 }
 0x1a2   :  { %208 = vrot.lane.b32.xlu1 %v194_v30, %s1888_s2 }
 0x20c   :  { %v198_v37 = vpop.permute.xlu1 %197 }
 0x20d   :  { %v200_v38 = vmul.f32 %v198_v37, %v177_v25 }
 0x20f   :  { %202 = vrot.lane.b32.xlu2 %v200_v38, %s1889_s4 }
 0x214   :  { %v209_v39 = vpop.permute.xlu1 %208 }
 0x215   :  { %211 = vst.msk [vmem:[#allocation3] sm:$0x3] %vm112_vm0, %v209_v39 }
 0x217   :  { %215 = vrot.lane.b32.xlu2 %v213_v40, %s1880_s13 }
 0x21c   :  { %v327_v42 = vld [vmem:[#allocation3] sm:$0x3] }
 0x21f   :  { %269 = vrot.lane.b32.xlu2 %v247_v41, %s1880_s13 }
 0x227   :  { %349 = vrot.lane.b32.xlu2 %v327_v42, %s1880_s13 }
 0x269   :  { %v203_v48 = vpop.permute.xlu2 %202 }
 0x26a   :  { %206 = vst.msk [vmem:[#allocation2] sm:$0x3] %vm112_vm0, %v203_v48 }
 0x271   :  { %v216_v49 = vpop.permute.xlu2 %215  ;;  %v302_v50 = vld [vmem:[#allocation2] sm:$0x3] }
 0x272   :  { %1505 = vmatmul.msk.f32.vlgmr.msra.gmra.mxu2 %vm134_vm1, %v302_v50  ;;  %v218_v51 = vsel %vm134_vm1, %v203_v48, %v216_v49 }
 0x273   :  { %1503 = vmatmul.msk.f32.vlgmr.msra.gmra.mxu1 %vm222_vm6, %v218_v51  ;;  %966 = vmatpush.msra.mxu2 %v1962_v0 }
 0x274   :  { %1368 = vmatpush.msra.mxu1 %v1996_v34 }
 0x275   :  { %967 = vmatpush.msra.mxu2 %v1964_v1 }
 0x276   :  { %1369 = vmatpush.msra.mxu1 %v1998_v35 }
 0x277   :  { %968 = vmatpush.msra.mxu2 %v1968_v3 }
 0x278   :  { %1370 = vmatpush.msra.mxu1 %v2002_v36 }
 0x279   :  { %969 = vmatpush.msra.mxu2 %v1973_v4  ;;  %v270_v30 = vpop.permute.xlu2 %269 }
 0x27a   :  { %1371 = vmatpush.msra.mxu1 %v2016_v43 }
 0x27c   :  { %1372 = vmatpush.msra.mxu1 %v2019_v44 }
 0x27e   :  { %1373 = vmatpush.msra.mxu1 %v2022_v45 }
 0x280   :  { %1374 = vmatpush.msra.mxu1 %v2027_v46 }
 0x281   :  { %v350_v37 = vpop.permute.xlu2 %349 }
 0x282   :  { %1375 = vmatpush.msra.mxu1 %v2035_v47 }
 0x2f0   :  { %v243_v53 = vpop.f32.mrf.mxu1 }
 0x2f1   :  { %v244_v54 = vadd.f32 %v2072_v52, %v243_v53 }
 0x2f3   :  { %1556 = vtanh.f32 %v244_v54  ;;  %v1504_v60 = vmul.f32 -1.442695, %v244_v54 }
 0x2f5   :  { %v323_v56 = vpop.f32.mrf.mxu2 }
 0x2f6   :  { %v326_v57 = vadd.f32 %v323_v56, %v301_v55 }
 0x2f8   :  { %1558 = vtanh.f32 %v326_v57  ;;  %v1506_v61 = vmul.f32 -1.442695, %v326_v57 }
 0x2f9   :  { %v1557_v58 = vpop.eup %1556  ;;  %1560 = vpow2.f32 %v1504_v60 }
 0x2fa   :  { %274 = vrot.lane.b32.xlu0 %v1557_v58, %s1880_s13  ;;  %1562 = vpow2.f32 %v1506_v61 }
 0x2fe   :  { %v1559_v59 = vpop.eup %1558 }
 0x2ff   :  { %354 = vrot.lane.b32.xlu1 %v1559_v59, %s1880_s13  ;;  %v1561_v62 = vpop.eup %1560 }
 0x300   :  { %v251_v63 = vadd.f32 1.0, %v1561_v62  ;;  %v1563_v2 = vpop.eup %1562 }
 0x301   :  { %v331_v5 = vadd.f32 1.0, %v1563_v2 }
 0x302   :  { %1564 = vrcp.f32 %v251_v63  ;;  %v263_v14 = vand.u32 2147483648, %v251_v63  ;;  %vm257_vm8 = vweird.f32 %v251_v63  ;;  %v261_v15 = vand.u32 2147483647, %v251_v63 }
 0x303   :  { %1566 = vrcp.f32 %v331_v5  ;;  %v343_v23 = vand.u32 2147483648, %v331_v5  ;;  %vm337_vm12 = vweird.f32 %v331_v5  ;;  %v341_v24 = vand.u32 2147483647, %v331_v5 }
 0x304   :  { %v264_v18 = vor.u32 1.1754944e-38, %v263_v14  ;;  %vm262_vm10 = vcmp.eq.f32.partialorder %v261_v15, 8.507059e+37 }
 0x305   :  { %v344_v26 = vor.u32 1.1754944e-38, %v343_v23  ;;  %vm342_vm14 = vcmp.eq.f32.partialorder %v341_v24, 8.507059e+37 }
 0x308   :  { %v1565_v6 = vpop.eup %1564 }
 0x309   :  { %v253_v7 = vmul.f32 %v1565_v6, %v251_v63  ;;  %v1567_v9 = vpop.eup %1566  ;;  %vm258_vm7 = vweird.f32 %v1565_v6  ;;  %v463_v63 = vld [vmem:[#allocation4 + $0x4] sm:$0x3] }
 0x30a   :  { %v333_v11 = vmul.f32 %v1567_v9, %v331_v5  ;;  %vm259_vm9 = vmor %vm257_vm8, %vm258_vm7  ;;  %vm338_vm11 = vweird.f32 %v1567_v9 }
 0x30b   :  { %v254_v8 = vsub.f32 1.0, %v253_v7  ;;  %vm339_vm13 = vmor %vm337_vm12, %vm338_vm11 }
 0x30c   :  { %v334_v13 = vsub.f32 1.0, %v333_v11 }
 0x30d   :  { %v255_v10 = vmul.f32 %v1565_v6, %v254_v8 }
 0x30e   :  { %v335_v17 = vmul.f32 %v1567_v9, %v334_v13 }
 0x30f   :  { %v256_v12 = vadd.f32 %v1565_v6, %v255_v10 }
 0x310   :  { %v336_v22 = vadd.f32 %v1567_v9, %v335_v17 }
 0x311   :  { %v260_v16 = vsel %vm259_vm9, %v1565_v6, %v256_v12 }
 0x312   :  { %v265_v20 = vsel %vm262_vm10, %v264_v18, %v260_v16  ;;  %v340_v25 = vsel %vm339_vm13, %v1567_v9, %v336_v22 }
 0x313   :  { %v345_v28 = vsel %vm342_vm14, %v344_v26, %v340_v25  ;;  %v272_v31 = vmul.f32 %v270_v30, %v265_v20 }
 0x314   :  { %v352_v38 = vmul.f32 %v350_v37, %v345_v28 }
 0x36c   :  { %v275_v19 = vpop.permute.xlu0 %274 }
 0x36d   :  { %v277_v21 = vmul.f32 %v275_v19, %v265_v20 }
 0x36f   :  { %279 = vrot.lane.b32.xlu0 %v277_v21, %s1880_s13 }
 0x371   :  { %v355_v27 = vpop.permute.xlu1 %354 }
 0x372   :  { %v357_v29 = vmul.f32 %v355_v27, %v345_v28 }
 0x377   :  { %359 = vrot.lane.b32.xlu0 %v357_v29, %s1880_s13 }
 0x3e1   :  { %v280_v32 = vpop.permute.xlu0 %279 }
 0x3e2   :  { %v282_v33 = vadd.f32 %v280_v32, %v272_v31 }
 0x3e4   :  { %1568 = vtanh.f32 %v282_v33 }
 0x3e9   :  { %v360_v39 = vpop.permute.xlu0 %359 }
 0x3ea   :  { %v1569_v40 = vpop.eup %1568  ;;  %v362_v41 = vadd.f32 %v360_v39, %v352_v38 }
 0x3eb   :  { %285 = vrot.lane.b32.xlu1 %v1569_v40, %s1880_s13 }
 0x3ec   :  { %1570 = vtanh.f32 %v362_v41 }
 0x3f2   :  { %v1571_v42 = vpop.eup %1570 }
 0x3f3   :  { %365 = vrot.lane.b32.xlu0 %v1571_v42, %s1880_s13 }
 0x3fb   :  { %295 = vrot.lane.b32.xlu0 %v282_v33, %s1888_s2 }
 0x45d   :  { %v286_v48 = vpop.permute.xlu1 %285 }
 0x45e   :  { %v288_v49 = vmul.f32 %v286_v48, %v265_v20 }
 0x460   :  { %290 = vrot.lane.b32.xlu2 %v288_v49, %s1889_s4 }
 0x465   :  { %v366_v50 = vpop.permute.xlu0 %365 }
 0x466   :  { %v368_v51 = vmul.f32 %v366_v50, %v345_v28 }
 0x468   :  { %370 = vrot.lane.b32.xlu1 %v368_v51, %s1889_s4 }
 0x46d   :  { %v296_v53 = vpop.permute.xlu0 %295 }
 0x46e   :  { %298 = vst.msk [vmem:[#allocation3 + $0x2] sm:$0x3] %vm112_vm0, %v296_v53 }
 0x475   :  { %v408_v54 = vld [vmem:[#allocation3 + $0x2] sm:$0x3] }
 0x476   :  { %430 = vrot.lane.b32.xlu0 %v408_v54, %s1880_s13 }
 0x4ba   :  { %v291_v55 = vpop.permute.xlu2 %290 }
 0x4bb   :  { %293 = vst.msk [vmem:[#allocation2 + $0x2] sm:$0x3] %vm112_vm0, %v291_v55 }
 0x4bc   :  { %299 = vst.msk [vmem:[#allocation13] sm:$0x3] %vm112_vm0, %v291_v55 }
 0x4c2   :  { %v379_v56 = vld [vmem:[#allocation2 + $0x2] sm:$0x3] }
 0x4c3   :  { %381 = vrot.lane.b32.xlu2 %v379_v56, %s1880_s13 }
 0x4cb   :  { %375 = vrot.lane.b32.xlu2 %v362_v41, %s1888_s2 }
 0x4da   :  { %v371_v57 = vpop.permute.xlu1 %370 }
 0x4db   :  { %373 = vst.msk [vmem:[#allocation2] sm:$0x3] %vm112_vm0, %v371_v57 }
 0x4e2   :  { %v464_v58 = vld [vmem:[#allocation2] sm:$0x3] }
 0x4e3   :  { %1509 = vmatmul.msk.f32.vlgmr.msrb.gmra.mxu0 %vm134_vm1, %v464_v58 }
 0x4e4   :  { %882 = vmatpush.msrb.mxu0 %v1996_v34 }
 0x4e6   :  { %883 = vmatpush.msrb.mxu0 %v1998_v35 }
 0x4e8   :  { %884 = vmatpush.msrb.mxu0 %v2002_v36  ;;  %v431_v48 = vpop.permute.xlu0 %430 }
 0x4ea   :  { %885 = vmatpush.msrb.mxu0 %v2016_v43 }
 0x4ec   :  { %886 = vmatpush.msrb.mxu0 %v2019_v44 }
 0x4ee   :  { %887 = vmatpush.msrb.mxu0 %v2022_v45 }
 0x4f0   :  { %888 = vmatpush.msrb.mxu0 %v2027_v46 }
 0x4f2   :  { %889 = vmatpush.msrb.mxu0 %v2035_v47 }
 0x51d   :  { %v382_v59 = vpop.permute.xlu2 %381 }
 0x51e   :  { %v384_v60 = vsel %vm134_vm1, %v371_v57, %v382_v59 }
 0x51f   :  { %1507 = vmatmul.msk.f32.vlgmr.msra.gmra.mxu3 %vm222_vm6, %v384_v60 }
 0x520   :  { %1044 = vmatpush.msra.mxu3 %v1996_v34 }
 0x522   :  { %1045 = vmatpush.msra.mxu3 %v1998_v35 }
 0x524   :  { %1046 = vmatpush.msra.mxu3 %v2002_v36 }
 0x525   :  { %v376_v61 = vpop.permute.xlu2 %375 }
 0x526   :  { %378 = vst.msk [vmem:[#allocation3] sm:$0x3] %vm112_vm0, %v376_v61  ;;  %1047 = vmatpush.msra.mxu3 %v2016_v43 }
 0x528   :  { %1048 = vmatpush.msra.mxu3 %v2019_v44 }
 0x52a   :  { %1049 = vmatpush.msra.mxu3 %v2022_v45 }
 0x52c   :  { %1050 = vmatpush.msra.mxu3 %v2027_v46 }
 0x52d   :  { %v489_v62 = vld [vmem:[#allocation3] sm:$0x3] }
 0x52e   :  { %511 = vrot.lane.b32.xlu0 %v489_v62, %s1880_s13  ;;  %1051 = vmatpush.msra.mxu3 %v2035_v47 }
 0x560   :  { %v485_v2 = vpop.f32.mrf.mxu0 }
 0x561   :  { %v488_v5 = vadd.f32 %v485_v2, %v463_v63 }
 0x563   :  { %1572 = vtanh.f32 %v488_v5  ;;  %v1510_v11 = vmul.f32 -1.442695, %v488_v5 }
 0x569   :  { %v1573_v6 = vpop.eup %1572 }
 0x56a   :  { %516 = vrot.lane.b32.xlu2 %v1573_v6, %s1880_s13 }
 0x5a0   :  { %v512_v53 = vpop.permute.xlu0 %511 }
 0x5a2   :  { %v405_v7 = vpop.f32.mrf.mxu3 }
 0x5a3   :  { %v406_v8 = vadd.f32 %v2072_v52, %v405_v7 }
 0x5a5   :  { %1574 = vtanh.f32 %v406_v8  ;;  %v1508_v10 = vmul.f32 -1.442695, %v406_v8 }
 0x5a7   :  { %1576 = vpow2.f32 %v1508_v10 }
 0x5a8   :  { %1578 = vpow2.f32 %v1510_v11 }
 0x5ab   :  { %v1575_v9 = vpop.eup %1574 }
 0x5ac   :  { %435 = vrot.lane.b32.xlu1 %v1575_v9, %s1880_s13 }
 0x5ad   :  { %v1577_v12 = vpop.eup %1576 }
 0x5ae   :  { %v412_v13 = vadd.f32 1.0, %v1577_v12  ;;  %v1579_v14 = vpop.eup %1578 }
 0x5af   :  { %v493_v15 = vadd.f32 1.0, %v1579_v14 }
 0x5b0   :  { %1580 = vrcp.f32 %v412_v13  ;;  %v424_v24 = vand.u32 2147483648, %v412_v13  ;;  %vm418_vm2 = vweird.f32 %v412_v13  ;;  %v422_v25 = vand.u32 2147483647, %v412_v13 }
 0x5b1   :  { %1582 = vrcp.f32 %v493_v15  ;;  %v505_v33 = vand.u32 2147483648, %v493_v15  ;;  %vm499_vm7 = vweird.f32 %v493_v15  ;;  %v503_v37 = vand.u32 2147483647, %v493_v15 }
 0x5b2   :  { %v425_v28 = vor.u32 1.1754944e-38, %v424_v24  ;;  %vm423_vm4 = vcmp.eq.f32.partialorder %v422_v25, 8.507059e+37 }
 0x5b3   :  { %v506_v39 = vor.u32 1.1754944e-38, %v505_v33  ;;  %vm504_vm9 = vcmp.eq.f32.partialorder %v503_v37, 8.507059e+37 }
 0x5b6   :  { %v1581_v16 = vpop.eup %1580 }
 0x5b7   :  { %v414_v17 = vmul.f32 %v1581_v16, %v412_v13  ;;  %v1583_v19 = vpop.eup %1582  ;;  %vm419_vm15 = vweird.f32 %v1581_v16  ;;  %v625_v13 = vld [vmem:[#allocation4 + $0x6] sm:$0x3] }
 0x5b8   :  { %v495_v20 = vmul.f32 %v1583_v19, %v493_v15  ;;  %vm420_vm3 = vmor %vm418_vm2, %vm419_vm15  ;;  %vm500_vm5 = vweird.f32 %v1583_v19 }
 0x5b9   :  { %v415_v18 = vsub.f32 1.0, %v414_v17  ;;  %vm501_vm8 = vmor %vm499_vm7, %vm500_vm5 }
 0x5ba   :  { %v496_v22 = vsub.f32 1.0, %v495_v20 }
 0x5bb   :  { %v416_v21 = vmul.f32 %v1581_v16, %v415_v18 }
 0x5bc   :  { %v497_v26 = vmul.f32 %v1583_v19, %v496_v22 }
 0x5bd   :  { %v417_v23 = vadd.f32 %v1581_v16, %v416_v21 }
 0x5be   :  { %v498_v31 = vadd.f32 %v1583_v19, %v497_v26 }
 0x5bf   :  { %v421_v27 = vsel %vm420_vm3, %v1581_v16, %v417_v23 }
 0x5c0   :  { %v426_v30 = vsel %vm423_vm4, %v425_v28, %v421_v27  ;;  %v502_v38 = vsel %vm501_vm8, %v1583_v19, %v498_v31 }
 0x5c1   :  { %v507_v41 = vsel %vm504_vm9, %v506_v39, %v502_v38  ;;  %v433_v49 = vmul.f32 %v431_v48, %v426_v30 }
 0x5c2   :  { %v514_v54 = vmul.f32 %v512_v53, %v507_v41 }
 0x5c4   :  { %v517_v40 = vpop.permute.xlu2 %516 }
 0x5c5   :  { %v519_v42 = vmul.f32 %v517_v40, %v507_v41 }
 0x61e   :  { %v436_v29 = vpop.permute.xlu1 %435 }
 0x61f   :  { %v438_v32 = vmul.f32 %v436_v29, %v426_v30 }
 0x621   :  { %440 = vrot.lane.b32.xlu1 %v438_v32, %s1880_s13 }
 0x629   :  { %521 = vrot.lane.b32.xlu1 %v519_v42, %s1880_s13 }
 0x693   :  { %v441_v50 = vpop.permute.xlu1 %440 }
 0x694   :  { %v443_v51 = vadd.f32 %v441_v50, %v433_v49 }
 0x696   :  { %1584 = vtanh.f32 %v443_v51 }
 0x69b   :  { %v522_v55 = vpop.permute.xlu1 %521 }
 0x69c   :  { %v1585_v56 = vpop.eup %1584  ;;  %v524_v57 = vadd.f32 %v522_v55, %v514_v54 }
 0x69d   :  { %446 = vrot.lane.b32.xlu2 %v1585_v56, %s1880_s13 }
 0x69e   :  { %1586 = vtanh.f32 %v524_v57 }
 0x6a4   :  { %v1587_v58 = vpop.eup %1586 }
 0x6a5   :  { %527 = vrot.lane.b32.xlu1 %v1587_v58, %s1880_s13 }
 0x6ad   :  { %456 = vrot.lane.b32.xlu1 %v443_v51, %s1888_s2 }
 0x6f7   :  { %v447_v59 = vpop.permute.xlu2 %446 }
 0x6f8   :  { %v449_v60 = vmul.f32 %v447_v59, %v426_v30 }
 0x6fa   :  { %451 = vrot.lane.b32.xlu0 %v449_v60, %s1889_s4 }
 0x717   :  { %v528_v61 = vpop.permute.xlu1 %527 }
 0x718   :  { %v530_v62 = vmul.f32 %v528_v61, %v507_v41 }
 0x71a   :  { %532 = vrot.lane.b32.xlu2 %v530_v62, %s1889_s4 }
 0x71f   :  { %v457_v63 = vpop.permute.xlu1 %456 }
 0x720   :  { %459 = vst.msk [vmem:[#allocation3 + $0x2] sm:$0x3] %vm112_vm0, %v457_v63 }
 0x727   :  { %v570_v2 = vld [vmem:[#allocation3 + $0x2] sm:$0x3] }
 0x728   :  { %592 = vrot.lane.b32.xlu1 %v570_v2, %s1880_s13 }
 0x76c   :  { %v452_v5 = vpop.permute.xlu0 %451 }
 0x76d   :  { %454 = vst.msk [vmem:[#allocation2 + $0x2] sm:$0x3] %vm112_vm0, %v452_v5 }
 0x76e   :  { %461 = vst.msk [vmem:[#allocation13 + $0x2] sm:$0x3] %vm112_vm0, %v452_v5 }
 0x774   :  { %v533_v6 = vpop.permute.xlu2 %532  ;;  %v541_v7 = vld [vmem:[#allocation2 + $0x2] sm:$0x3] }
 0x775   :  { %535 = vst.msk [vmem:[#allocation2] sm:$0x3] %vm112_vm0, %v533_v6  ;;  %543 = vrot.lane.b32.xlu0 %v541_v7, %s1880_s13 }
 0x77c   :  { %v626_v8 = vld [vmem:[#allocation2] sm:$0x3] }
 0x77d   :  { %537 = vrot.lane.b32.xlu0 %v524_v57, %s1888_s2  ;;  %1513 = vmatmul.msk.f32.vlgmr.msra.gmra.mxu0 %vm134_vm1, %v626_v8 }
 0x77e   :  { %1290 = vmatpush.msra.mxu0 %v1962_v0 }
 0x780   :  { %1291 = vmatpush.msra.mxu0 %v1964_v1 }
 0x782   :  { %1292 = vmatpush.msra.mxu0 %v1968_v3 }
 0x784   :  { %1293 = vmatpush.msra.mxu0 %v1973_v4 }
 0x79a   :  { %v593_v50 = vpop.permute.xlu1 %592 }
 0x7e7   :  { %v544_v9 = vpop.permute.xlu0 %543 }
 0x7e8   :  { %v546_v10 = vsel %vm134_vm1, %v533_v6, %v544_v9 }
 0x7e9   :  { %1511 = vmatmul.msk.f32.vlgmr.msrb.gmra.mxu2 %vm222_vm6, %v546_v10 }
 0x7ea   :  { %1206 = vmatpush.msrb.mxu2 %v1996_v34 }
 0x7ec   :  { %1207 = vmatpush.msrb.mxu2 %v1998_v35 }
 0x7ee   :  { %1208 = vmatpush.msrb.mxu2 %v2002_v36 }
 0x7ef   :  { %v538_v11 = vpop.permute.xlu0 %537 }
 0x7f0   :  { %540 = vst.msk [vmem:[#allocation3] sm:$0x3] %vm112_vm0, %v538_v11  ;;  %1209 = vmatpush.msrb.mxu2 %v2016_v43  ;;  %v787_v11 = vld [vmem:[#allocation4 + $0x8] sm:$0x3] }
 0x7f2   :  { %1210 = vmatpush.msrb.mxu2 %v2019_v44 }
 0x7f4   :  { %1211 = vmatpush.msrb.mxu2 %v2022_v45 }
 0x7f6   :  { %1212 = vmatpush.msrb.mxu2 %v2027_v46 }
 0x7f7   :  { %v651_v12 = vld [vmem:[#allocation3] sm:$0x3] }
 0x7f8   :  { %673 = vrot.lane.b32.xlu1 %v651_v12, %s1880_s13  ;;  %1213 = vmatpush.msrb.mxu2 %v2035_v47 }
 0x7fa   :  { %v647_v34 = vpop.f32.mrf.mxu0 }
 0x7fb   :  { %v650_v35 = vadd.f32 %v647_v34, %v625_v13 }
 0x7fd   :  { %1588 = vtanh.f32 %v650_v35  ;;  %v1514_v46 = vmul.f32 -1.442695, %v650_v35 }
 0x803   :  { %v1589_v36 = vpop.eup %1588 }
 0x804   :  { %678 = vrot.lane.b32.xlu0 %v1589_v36, %s1880_s13 }
 0x86a   :  { %v674_v55 = vpop.permute.xlu1 %673 }
 0x86c   :  { %v567_v14 = vpop.f32.mrf.mxu2 }
 0x86d   :  { %v568_v43 = vadd.f32 %v2072_v52, %v567_v14 }
 0x86f   :  { %1590 = vtanh.f32 %v568_v43  ;;  %v1512_v45 = vmul.f32 -1.442695, %v568_v43 }
 0x871   :  { %1592 = vpow2.f32 %v1512_v45 }
 0x872   :  { %1594 = vpow2.f32 %v1514_v46 }
 0x875   :  { %v1591_v44 = vpop.eup %1590 }
 0x876   :  { %597 = vrot.lane.b32.xlu2 %v1591_v44, %s1880_s13  ;;  %v679_v42 = vpop.permute.xlu0 %678 }
 0x877   :  { %v1593_v15 = vpop.eup %1592 }
 0x878   :  { %v574_v16 = vadd.f32 1.0, %v1593_v15  ;;  %v1595_v47 = vpop.eup %1594 }
 0x879   :  { %v655_v17 = vadd.f32 1.0, %v1595_v47 }
 0x87a   :  { %1596 = vrcp.f32 %v574_v16  ;;  %v586_v26 = vand.u32 2147483648, %v574_v16  ;;  %vm580_vm11 = vweird.f32 %v574_v16  ;;  %v584_v27 = vand.u32 2147483647, %v574_v16 }
 0x87b   :  { %1598 = vrcp.f32 %v655_v17  ;;  %v667_v38 = vand.u32 2147483648, %v655_v17  ;;  %vm661_vm15 = vweird.f32 %v655_v17  ;;  %v665_v39 = vand.u32 2147483647, %v655_v17 }
 0x87c   :  { %v587_v30 = vor.u32 1.1754944e-38, %v586_v26  ;;  %vm585_vm13 = vcmp.eq.f32.partialorder %v584_v27, 8.507059e+37 }
 0x87d   :  { %v668_v41 = vor.u32 1.1754944e-38, %v667_v38  ;;  %vm666_vm3 = vcmp.eq.f32.partialorder %v665_v39, 8.507059e+37 }
 0x880   :  { %v1597_v18 = vpop.eup %1596 }
 0x881   :  { %v576_v19 = vmul.f32 %v1597_v18, %v574_v16  ;;  %v1599_v21 = vpop.eup %1598  ;;  %vm581_vm10 = vweird.f32 %v1597_v18 }
 0x882   :  { %v657_v22 = vmul.f32 %v1599_v21, %v655_v17  ;;  %vm582_vm12 = vmor %vm580_vm11, %vm581_vm10  ;;  %vm662_vm14 = vweird.f32 %v1599_v21 }
 0x883   :  { %v577_v20 = vsub.f32 1.0, %v576_v19  ;;  %vm663_vm2 = vmor %vm661_vm15, %vm662_vm14 }
 0x884   :  { %v658_v24 = vsub.f32 1.0, %v657_v22 }
 0x885   :  { %v578_v23 = vmul.f32 %v1597_v18, %v577_v20 }
 0x886   :  { %v659_v28 = vmul.f32 %v1599_v21, %v658_v24 }
 0x887   :  { %v579_v25 = vadd.f32 %v1597_v18, %v578_v23 }
 0x888   :  { %v660_v33 = vadd.f32 %v1599_v21, %v659_v28 }
 0x889   :  { %v583_v29 = vsel %vm582_vm12, %v1597_v18, %v579_v25 }
 0x88a   :  { %v588_v32 = vsel %vm585_vm13, %v587_v30, %v583_v29  ;;  %v664_v40 = vsel %vm663_vm2, %v1599_v21, %v660_v33 }
 0x88b   :  { %v669_v48 = vsel %vm666_vm3, %v668_v41, %v664_v40  ;;  %v595_v51 = vmul.f32 %v593_v50, %v588_v32 }
 0x88c   :  { %v681_v49 = vmul.f32 %v679_v42, %v669_v48  ;;  %v676_v56 = vmul.f32 %v674_v55, %v669_v48 }
 0x8d0   :  { %v598_v31 = vpop.permute.xlu2 %597 }
 0x8d1   :  { %v600_v37 = vmul.f32 %v598_v31, %v588_v32 }
 0x8d3   :  { %602 = vrot.lane.b32.xlu2 %v600_v37, %s1880_s13 }
 0x8db   :  { %683 = vrot.lane.b32.xlu2 %v681_v49, %s1880_s13 }
 0x92d   :  { %v603_v53 = vpop.permute.xlu2 %602 }
 0x92e   :  { %v605_v54 = vadd.f32 %v603_v53, %v595_v51 }
 0x930   :  { %1600 = vtanh.f32 %v605_v54 }
 0x935   :  { %v684_v57 = vpop.permute.xlu2 %683 }
 0x936   :  { %v1601_v58 = vpop.eup %1600  ;;  %v686_v59 = vadd.f32 %v684_v57, %v676_v56 }
 0x937   :  { %608 = vrot.lane.b32.xlu0 %v1601_v58, %s1880_s13 }
 0x938   :  { %1602 = vtanh.f32 %v686_v59 }
 0x93e   :  { %v1603_v60 = vpop.eup %1602 }
 0x93f   :  { %689 = vrot.lane.b32.xlu2 %v1603_v60, %s1880_s13 }
 0x947   :  { %618 = vrot.lane.b32.xlu2 %v605_v54, %s1888_s2 }
 0x999   :  { %v690_v61 = vpop.permute.xlu2 %689 }
 0x99a   :  { %v692_v62 = vmul.f32 %v690_v61, %v669_v48 }
 0x99c   :  { %694 = vrot.lane.b32.xlu0 %v692_v62, %s1889_s4 }
 0x9a1   :  { %v619_v63 = vpop.permute.xlu2 %618 }
 0x9a2   :  { %621 = vst.msk [vmem:[#allocation3 + $0x2] sm:$0x3] %vm112_vm0, %v619_v63 }
 0x9a9   :  { %v609_v2 = vpop.permute.xlu0 %608  ;;  %v732_v5 = vld [vmem:[#allocation3 + $0x2] sm:$0x3] }
 0x9aa   :  { %v611_v6 = vmul.f32 %v609_v2, %v588_v32  ;;  %754 = vrot.lane.b32.xlu2 %v732_v5, %s1880_s13 }
 0x9ac   :  { %613 = vrot.lane.b32.xlu1 %v611_v6, %s1889_s4 }
 0xa04   :  { %v755_v48 = vpop.permute.xlu2 %754 }
 0xa0e   :  { %v695_v7 = vpop.permute.xlu0 %694 }
 0xa0f   :  { %697 = vst.msk [vmem:[#allocation2] sm:$0x3] %vm112_vm0, %v695_v7 }
 0xa16   :  { %v788_v8 = vld [vmem:[#allocation2] sm:$0x3] }
 0xa17   :  { %1517 = vmatmul.msk.f32.vlgmr.msrb.gmra.mxu3 %vm134_vm1, %v788_v8 }
 0xa18   :  { %1128 = vmatpush.msrb.mxu3 %v1962_v0 }
 0xa1a   :  { %1129 = vmatpush.msrb.mxu3 %v1964_v1 }
 0xa1c   :  { %1130 = vmatpush.msrb.mxu3 %v1968_v3 }
 0xa1e   :  { %v614_v9 = vpop.permute.xlu1 %613  ;;  %1131 = vmatpush.msrb.mxu3 %v1973_v4 }
 0xa1f   :  { %616 = vst.msk [vmem:[#allocation2 + $0x2] sm:$0x3] %vm112_vm0, %v614_v9 }
 0xa20   :  { %623 = vst.msk [vmem:[#allocation13 + $0x4] sm:$0x3] %vm112_vm0, %v614_v9 }
 0xa26   :  { %v703_v10 = vld [vmem:[#allocation2 + $0x2] sm:$0x3] }
 0xa27   :  { %705 = vrot.lane.b32.xlu1 %v703_v10, %s1880_s13 }
 0xa2f   :  { %699 = vrot.lane.b32.xlu1 %v686_v59, %s1888_s2 }
 0xa99   :  { %v706_v12 = vpop.permute.xlu1 %705 }
 0xa9a   :  { %v708_v0 = vsel %vm134_vm1, %v695_v7, %v706_v12  ;;  %v809_v13 = vpop.f32.mrf.mxu3 }
 0xa9b   :  { %v812_v1 = vadd.f32 %v809_v13, %v787_v11  ;;  %1515 = vmatmul.msk.f32.vlgmr.msrb.gmra.mxu1 %vm222_vm6, %v708_v0  ;;  %v949_v0 = vld [vmem:[#allocation4 + $0xa] sm:$0x3] }
 0xa9d   :  { %1604 = vtanh.f32 %v812_v1  ;;  %v1518_v44 = vmul.f32 -1.442695, %v812_v1 }
 0xaa1   :  { %v700_v3 = vpop.permute.xlu1 %699 }
 0xaa2   :  { %702 = vst.msk [vmem:[#allocation3] sm:$0x3] %vm112_vm0, %v700_v3 }
 0xaa3   :  { %v1605_v4 = vpop.eup %1604 }
 0xaa4   :  { %840 = vrot.lane.b32.xlu1 %v1605_v4, %s1880_s13 }
 0xaa9   :  { %v813_v34 = vld [vmem:[#allocation3] sm:$0x3] }
 0xaaa   :  { %835 = vrot.lane.b32.xlu2 %v813_v34, %s1880_s13 }
 0xb04   :  { %v836_v53 = vpop.permute.xlu2 %835 }
 0xb16   :  { %v841_v40 = vpop.permute.xlu1 %840 }
 0xb18   :  { %v729_v35 = vpop.f32.mrf.mxu1 }
 0xb19   :  { %v730_v36 = vadd.f32 %v2072_v52, %v729_v35 }
 0xb1b   :  { %1606 = vtanh.f32 %v730_v36  ;;  %v1516_v43 = vmul.f32 -1.442695, %v730_v36 }
 0xb1d   :  { %1608 = vpow2.f32 %v1516_v43 }
 0xb1e   :  { %1610 = vpow2.f32 %v1518_v44 }
 0xb21   :  { %v1607_v14 = vpop.eup %1606 }
 0xb22   :  { %759 = vrot.lane.b32.xlu0 %v1607_v14, %s1880_s13 }
 0xb23   :  { %v1609_v45 = vpop.eup %1608 }
 0xb24   :  { %v736_v46 = vadd.f32 1.0, %v1609_v45  ;;  %v1611_v15 = vpop.eup %1610 }
 0xb25   :  { %v817_v16 = vadd.f32 1.0, %v1611_v15 }
 0xb26   :  { %1612 = vrcp.f32 %v736_v46  ;;  %v748_v24 = vand.u32 2147483648, %v736_v46  ;;  %vm742_vm5 = vweird.f32 %v736_v46  ;;  %v746_v25 = vand.u32 2147483647, %v736_v46 }
 0xb27   :  { %1614 = vrcp.f32 %v817_v16  ;;  %v829_v33 = vand.u32 2147483648, %v817_v16  ;;  %vm823_vm10 = vweird.f32 %v817_v16  ;;  %v827_v37 = vand.u32 2147483647, %v817_v16 }
 0xb28   :  { %v749_v28 = vor.u32 1.1754944e-38, %v748_v24  ;;  %vm747_vm8 = vcmp.eq.f32.partialorder %v746_v25, 8.507059e+37 }
 0xb29   :  { %v830_v39 = vor.u32 1.1754944e-38, %v829_v33  ;;  %vm828_vm12 = vcmp.eq.f32.partialorder %v827_v37, 8.507059e+37 }
 0xb2c   :  { %v1613_v47 = vpop.eup %1612 }
 0xb2d   :  { %v738_v17 = vmul.f32 %v1613_v47, %v736_v46  ;;  %v1615_v19 = vpop.eup %1614  ;;  %vm743_vm4 = vweird.f32 %v1613_v47 }
 0xb2e   :  { %v819_v20 = vmul.f32 %v1615_v19, %v817_v16  ;;  %vm744_vm7 = vmor %vm742_vm5, %vm743_vm4  ;;  %vm824_vm9 = vweird.f32 %v1615_v19 }
 0xb2f   :  { %v739_v18 = vsub.f32 1.0, %v738_v17  ;;  %vm825_vm11 = vmor %vm823_vm10, %vm824_vm9 }
 0xb30   :  { %v820_v22 = vsub.f32 1.0, %v819_v20 }
 0xb31   :  { %v740_v21 = vmul.f32 %v1613_v47, %v739_v18 }
 0xb32   :  { %v821_v26 = vmul.f32 %v1615_v19, %v820_v22 }
 0xb33   :  { %v741_v23 = vadd.f32 %v1613_v47, %v740_v21 }
 0xb34   :  { %v822_v31 = vadd.f32 %v1615_v19, %v821_v26 }
 0xb35   :  { %v745_v27 = vsel %vm744_vm7, %v1613_v47, %v741_v23 }
 0xb36   :  { %v750_v30 = vsel %vm747_vm8, %v749_v28, %v745_v27  ;;  %v826_v38 = vsel %vm825_vm11, %v1615_v19, %v822_v31 }
 0xb37   :  { %v831_v41 = vsel %vm828_vm12, %v830_v39, %v826_v38  ;;  %v757_v49 = vmul.f32 %v755_v48, %v750_v30 }
 0xb38   :  { %v843_v42 = vmul.f32 %v841_v40, %v831_v41  ;;  %v838_v54 = vmul.f32 %v836_v53, %v831_v41 }
 0xb94   :  { %v760_v29 = vpop.permute.xlu0 %759 }
 0xb95   :  { %v762_v32 = vmul.f32 %v760_v29, %v750_v30 }
 0xb97   :  { %764 = vrot.lane.b32.xlu0 %v762_v32, %s1880_s13 }
 0xb9f   :  { %845 = vrot.lane.b32.xlu0 %v843_v42, %s1880_s13 }
 0xc09   :  { %v765_v50 = vpop.permute.xlu0 %764 }
 0xc0a   :  { %v767_v51 = vadd.f32 %v765_v50, %v757_v49 }
 0xc0c   :  { %1616 = vtanh.f32 %v767_v51 }
 0xc11   :  { %v846_v55 = vpop.permute.xlu0 %845 }
 0xc12   :  { %v1617_v56 = vpop.eup %1616  ;;  %v848_v57 = vadd.f32 %v846_v55, %v838_v54 }
 0xc13   :  { %770 = vrot.lane.b32.xlu1 %v1617_v56, %s1880_s13 }
 0xc14   :  { %1618 = vtanh.f32 %v848_v57 }
 0xc1a   :  { %v1619_v58 = vpop.eup %1618 }
 0xc1b   :  { %851 = vrot.lane.b32.xlu0 %v1619_v58, %s1880_s13 }
 0xc23   :  { %780 = vrot.lane.b32.xlu0 %v767_v51, %s1888_s2 }
 0xc85   :  { %v771_v59 = vpop.permute.xlu1 %770 }
 0xc86   :  { %v773_v60 = vmul.f32 %v771_v59, %v750_v30 }
 0xc88   :  { %775 = vrot.lane.b32.xlu2 %v773_v60, %s1889_s4 }
 0xc8d   :  { %v852_v61 = vpop.permute.xlu0 %851 }
 0xc8e   :  { %v854_v62 = vmul.f32 %v852_v61, %v831_v41 }
 0xc90   :  { %856 = vrot.lane.b32.xlu1 %v854_v62, %s1889_s4 }
 0xc95   :  { %v781_v63 = vpop.permute.xlu0 %780 }
 0xc96   :  { %783 = vst.msk [vmem:[#allocation3 + $0x2] sm:$0x3] %vm112_vm0, %v781_v63 }
 0xc9d   :  { %v894_v2 = vld [vmem:[#allocation3 + $0x2] sm:$0x3] }
 0xc9e   :  { %916 = vrot.lane.b32.xlu0 %v894_v2, %s1880_s13 }
 0xce2   :  { %v776_v5 = vpop.permute.xlu2 %775 }
 0xce3   :  { %778 = vst.msk [vmem:[#allocation2 + $0x2] sm:$0x3] %vm112_vm0, %v776_v5 }
 0xce4   :  { %785 = vst.msk [vmem:[#allocation13 + $0x6] sm:$0x3] %vm112_vm0, %v776_v5 }
 0xcea   :  { %v865_v6 = vld [vmem:[#allocation2 + $0x2] sm:$0x3] }
 0xceb   :  { %867 = vrot.lane.b32.xlu2 %v865_v6, %s1880_s13 }
 0xcf3   :  { %861 = vrot.lane.b32.xlu2 %v848_v57, %s1888_s2 }
 0xd02   :  { %v857_v7 = vpop.permute.xlu1 %856 }
 0xd03   :  { %859 = vst.msk [vmem:[#allocation2] sm:$0x3] %vm112_vm0, %v857_v7 }
 0xd0a   :  { %v950_v8 = vld [vmem:[#allocation2] sm:$0x3] }
 0xd0b   :  { %1521 = vmatmul.msk.f32.vlgmr.msra.gmra.mxu2 %vm134_vm1, %v950_v8 }
 0xd10   :  { %v917_v40 = vpop.permute.xlu0 %916 }
 0xd45   :  { %v868_v9 = vpop.permute.xlu2 %867 }
 0xd46   :  { %v870_v10 = vsel %vm134_vm1, %v857_v7, %v868_v9 }
 0xd47   :  { %1519 = vmatmul.msk.f32.vlgmr.msrb.gmra.mxu0 %vm222_vm6, %v870_v10 }
 0xd4d   :  { %v862_v11 = vpop.permute.xlu2 %861 }
 0xd4e   :  { %864 = vst.msk [vmem:[#allocation3] sm:$0x3] %vm112_vm0, %v862_v11  ;;  %v2219_v11 = vld [vmem:[%s2299_s5] ss:$0 sm:$0xff]  ;;  %s1890_s5 = smov [#allocation13]  }
 0xd4f   :  { %s1449_s15 = sshll.u32 %s1890_s5, 4  ;;  %s1450_s15 = int_to_ptr.vmem [resolvable:$true] %s1449_s15 }
 0xd55   :  { %v975_v12 = vld [vmem:[#allocation3] sm:$0x3] }
 0xd56   :  { %997 = vrot.lane.b32.xlu0 %v975_v12, %s1880_s13 }
 0xd8e   :  { %v971_v13 = vpop.f32.mrf.mxu2 }
 0xd8f   :  { %v974_v1 = vadd.f32 %v971_v13, %v949_v0  ;;  %v1111_v0 = vld [vmem:[#allocation4 + $0xc] sm:$0x3] }
 0xd91   :  { %1620 = vtanh.f32 %v974_v1  ;;  %v1522_v14 = vmul.f32 -1.442695, %v974_v1 }
 0xd97   :  { %v1621_v3 = vpop.eup %1620 }
 0xd98   :  { %1002 = vrot.lane.b32.xlu2 %v1621_v3, %s1880_s13 }
 0xdc4   :  { %v891_v4 = vpop.f32.mrf.mxu0 }
 0xdc5   :  { %v892_v34 = vadd.f32 %v2072_v52, %v891_v4 }
 0xdc7   :  { %1622 = vtanh.f32 %v892_v34  ;;  %v1520_v36 = vmul.f32 -1.442695, %v892_v34 }
 0xdc8   :  { %v998_v49 = vpop.permute.xlu0 %997 }
 0xdc9   :  { %1624 = vpow2.f32 %v1520_v36 }
 0xdca   :  { %1626 = vpow2.f32 %v1522_v14 }
 0xdcd   :  { %v1623_v35 = vpop.eup %1622 }
 0xdce   :  { %921 = vrot.lane.b32.xlu1 %v1623_v35, %s1880_s13 }
 0xdcf   :  { %v1625_v43 = vpop.eup %1624 }
 0xdd0   :  { %v898_v44 = vadd.f32 1.0, %v1625_v43  ;;  %v1627_v45 = vpop.eup %1626 }
 0xdd1   :  { %v979_v46 = vadd.f32 1.0, %v1627_v45 }
 0xdd2   :  { %1628 = vrcp.f32 %v898_v44  ;;  %v910_v21 = vand.u32 2147483648, %v898_v44  ;;  %vm904_vm14 = vweird.f32 %v898_v44  ;;  %v908_v22 = vand.u32 2147483647, %v898_v44 }
 0xdd3   :  { %1630 = vrcp.f32 %v979_v46  ;;  %v991_v30 = vand.u32 2147483648, %v979_v46  ;;  %vm985_vm4 = vweird.f32 %v979_v46  ;;  %v989_v31 = vand.u32 2147483647, %v979_v46 }
 0xdd4   :  { %v911_v25 = vor.u32 1.1754944e-38, %v910_v21  ;;  %vm909_vm2 = vcmp.eq.f32.partialorder %v908_v22, 8.507059e+37 }
 0xdd5   :  { %v992_v33 = vor.u32 1.1754944e-38, %v991_v30  ;;  %vm990_vm7 = vcmp.eq.f32.partialorder %v989_v31, 8.507059e+37 }
 0xdd8   :  { %v1629_v15 = vpop.eup %1628 }
 0xdd9   :  { %v900_v16 = vmul.f32 %v1629_v15, %v898_v44  ;;  %v1631_v17 = vpop.eup %1630  ;;  %vm905_vm13 = vweird.f32 %v1629_v15 }
 0xdda   :  { %v981_v18 = vmul.f32 %v1631_v17, %v979_v46  ;;  %vm906_vm15 = vmor %vm904_vm14, %vm905_vm13  ;;  %vm986_vm3 = vweird.f32 %v1631_v17 }
 0xddb   :  { %v901_v47 = vsub.f32 1.0, %v900_v16  ;;  %vm987_vm5 = vmor %vm985_vm4, %vm986_vm3 }
 0xddc   :  { %v982_v19 = vsub.f32 1.0, %v981_v18 }
 0xddd   :  { %v902_v52 = vmul.f32 %v1629_v15, %v901_v47 }
 0xdde   :  { %v983_v23 = vmul.f32 %v1631_v17, %v982_v19 }
 0xddf   :  { %v903_v20 = vadd.f32 %v1629_v15, %v902_v52 }
 0xde0   :  { %v984_v28 = vadd.f32 %v1631_v17, %v983_v23 }
 0xde1   :  { %v907_v24 = vsel %vm906_vm15, %v1629_v15, %v903_v20 }
 0xde2   :  { %v912_v27 = vsel %vm909_vm2, %v911_v25, %v907_v24  ;;  %v988_v32 = vsel %vm987_vm5, %v1631_v17, %v984_v28 }
 0xde3   :  { %v993_v38 = vsel %vm990_vm7, %v992_v33, %v988_v32  ;;  %v919_v41 = vmul.f32 %v917_v40, %v912_v27 }
 0xde4   :  { %v1000_v50 = vmul.f32 %v998_v49, %v993_v38 }
 0xdf2   :  { %v1003_v37 = vpop.permute.xlu2 %1002 }
 0xdf3   :  { %v1005_v39 = vmul.f32 %v1003_v37, %v993_v38 }
 0xe40   :  { %v922_v26 = vpop.permute.xlu1 %921 }
 0xe41   :  { %v924_v29 = vmul.f32 %v922_v26, %v912_v27 }
 0xe43   :  { %926 = vrot.lane.b32.xlu1 %v924_v29, %s1880_s13 }
 0xe4b   :  { %1007 = vrot.lane.b32.xlu1 %v1005_v39, %s1880_s13 }
 0xeb5   :  { %v927_v42 = vpop.permute.xlu1 %926 }
 0xeb6   :  { %v929_v48 = vadd.f32 %v927_v42, %v919_v41 }
 0xeb8   :  { %1632 = vtanh.f32 %v929_v48 }
 0xebd   :  { %v1008_v51 = vpop.permute.xlu1 %1007 }
 0xebe   :  { %v1633_v53 = vpop.eup %1632  ;;  %v1010_v54 = vadd.f32 %v1008_v51, %v1000_v50 }
 0xebf   :  { %932 = vrot.lane.b32.xlu2 %v1633_v53, %s1880_s13 }
 0xec0   :  { %1634 = vtanh.f32 %v1010_v54 }
 0xec6   :  { %v1635_v55 = vpop.eup %1634 }
 0xec7   :  { %1013 = vrot.lane.b32.xlu1 %v1635_v55, %s1880_s13 }
 0xecf   :  { %942 = vrot.lane.b32.xlu1 %v929_v48, %s1888_s2 }
 0xf19   :  { %v933_v56 = vpop.permute.xlu2 %932 }
 0xf1a   :  { %v935_v57 = vmul.f32 %v933_v56, %v912_v27 }
 0xf1c   :  { %937 = vrot.lane.b32.xlu0 %v935_v57, %s1889_s4 }
 0xf39   :  { %v1014_v58 = vpop.permute.xlu1 %1013 }
 0xf3a   :  { %v1016_v59 = vmul.f32 %v1014_v58, %v993_v38 }
 0xf3c   :  { %1018 = vrot.lane.b32.xlu2 %v1016_v59, %s1889_s4 }
 0xf41   :  { %v943_v60 = vpop.permute.xlu1 %942 }
 0xf42   :  { %945 = vst.msk [vmem:[#allocation3 + $0x2] sm:$0x3] %vm112_vm0, %v943_v60 }
 0xf49   :  { %v1056_v61 = vld [vmem:[#allocation3 + $0x2] sm:$0x3] }
 0xf4a   :  { %1078 = vrot.lane.b32.xlu1 %v1056_v61, %s1880_s13 }
 0xf8e   :  { %v938_v62 = vpop.permute.xlu0 %937 }
 0xf8f   :  { %940 = vst.msk [vmem:[#allocation2 + $0x2] sm:$0x3] %vm112_vm0, %v938_v62 }
 0xf90   :  { %947 = vst.msk [vmem:[#allocation13 + $0x8] sm:$0x3] %vm112_vm0, %v938_v62 }
 0xf96   :  { %v1019_v63 = vpop.permute.xlu2 %1018  ;;  %v1027_v2 = vld [vmem:[#allocation2 + $0x2] sm:$0x3] }
 0xf97   :  { %1021 = vst.msk [vmem:[#allocation2] sm:$0x3] %vm112_vm0, %v1019_v63  ;;  %1029 = vrot.lane.b32.xlu0 %v1027_v2, %s1880_s13 }
 0xf9e   :  { %v1112_v8 = vld [vmem:[#allocation2] sm:$0x3] }
 0xf9f   :  { %1023 = vrot.lane.b32.xlu0 %v1010_v54, %s1888_s2 }
 0xfbc   :  { %v1079_v38 = vpop.permute.xlu1 %1078 }
0x1009   :  { %v1030_v5 = vpop.permute.xlu0 %1029 }
0x100a   :  { %v1032_v6 = vsel %vm134_vm1, %v1019_v63, %v1030_v5 }
0x100b   :  { %1523 = vmatmul.msk.f32.vlgmr.msra.gmra.mxu3 %vm222_vm6, %v1032_v6 }
0x1011   :  { %v1024_v7 = vpop.permute.xlu0 %1023 }
0x1012   :  { %1026 = vst.msk [vmem:[#allocation3] sm:$0x3] %vm112_vm0, %v1024_v7 }
0x1013   :  { %1525 = vmatmul.msk.f32.vlgmr.msrb.gmra.mxu3 %vm134_vm1, %v1112_v8  ;;  %v1273_v8 = vld [vmem:[#allocation4 + $0xe] sm:$0x3] }
0x1019   :  { %v1137_v9 = vld [vmem:[#allocation3] sm:$0x3] }
0x101a   :  { %1159 = vrot.lane.b32.xlu1 %v1137_v9, %s1880_s13 }
0x108c   :  { %v1160_v48 = vpop.permute.xlu1 %1159 }
0x108e   :  { %v1053_v10 = vpop.f32.mrf.mxu3 }
0x108f   :  { %v1054_v12 = vadd.f32 %v2219_v11, %v1053_v10 }
0x1091   :  { %1636 = vtanh.f32 %v1054_v12  ;;  %v1524_v34 = vmul.f32 -1.442695, %v1054_v12 }
0x1096   :  { %v1133_v13 = vpop.f32.mrf.mxu3 }
0x1097   :  { %v1637_v1 = vpop.eup %1636  ;;  %v1136_v3 = vadd.f32 %v1133_v13, %v1111_v0 }
0x1098   :  { %1083 = vrot.lane.b32.xlu2 %v1637_v1, %s1880_s13 }
0x1099   :  { %1638 = vtanh.f32 %v1136_v3  ;;  %v1526_v45 = vmul.f32 -1.442695, %v1136_v3 }
0x109a   :  { %1640 = vpow2.f32 %v1524_v34 }
0x109f   :  { %v1639_v4 = vpop.eup %1638 }
0x10a0   :  { %1164 = vrot.lane.b32.xlu0 %v1639_v4, %s1880_s13  ;;  %v1641_v35 = vpop.eup %1640 }
0x10a1   :  { %v1060_v36 = vadd.f32 1.0, %v1641_v35 }
0x10a3   :  { %1642 = vrcp.f32 %v1060_v36  ;;  %v1072_v16 = vand.u32 2147483648, %v1060_v36  ;;  %vm1066_vm9 = vweird.f32 %v1060_v36  ;;  %v1070_v47 = vand.u32 2147483647, %v1060_v36 }
0x10a4   :  { %1644 = vpow2.f32 %v1526_v45 }
0x10a5   :  { %v1073_v52 = vor.u32 1.1754944e-38, %v1072_v16  ;;  %vm1071_vm11 = vcmp.eq.f32.partialorder %v1070_v47, 8.507059e+37 }
0x10a9   :  { %v1643_v14 = vpop.eup %1642 }
0x10aa   :  { %v1062_v43 = vmul.f32 %v1643_v14, %v1060_v36  ;;  %vm1067_vm8 = vweird.f32 %v1643_v14  ;;  %v1645_v17 = vpop.eup %1644 }
0x10ab   :  { %vm1068_vm10 = vmor %vm1066_vm9, %vm1067_vm8  ;;  %v1141_v19 = vadd.f32 1.0, %v1645_v17 }
0x10ac   :  { %v1063_v44 = vsub.f32 1.0, %v1062_v43 }
0x10ad   :  { %1646 = vrcp.f32 %v1141_v19  ;;  %v1153_v28 = vand.u32 2147483648, %v1141_v19  ;;  %vm1147_vm13 = vweird.f32 %v1141_v19  ;;  %v1151_v29 = vand.u32 2147483647, %v1141_v19 }
0x10ae   :  { %v1064_v46 = vmul.f32 %v1643_v14, %v1063_v44 }
0x10af   :  { %v1154_v31 = vor.u32 1.1754944e-38, %v1153_v28  ;;  %vm1152_vm15 = vcmp.eq.f32.partialorder %v1151_v29, 8.507059e+37 }
0x10b0   :  { %v1065_v15 = vadd.f32 %v1643_v14, %v1064_v46 }
0x10b2   :  { %v1069_v18 = vsel %vm1068_vm10, %v1643_v14, %v1065_v15 }
0x10b3   :  { %v1074_v21 = vsel %vm1071_vm11, %v1073_v52, %v1069_v18  ;;  %v1647_v23 = vpop.eup %1646 }
0x10b4   :  { %v1143_v24 = vmul.f32 %v1647_v23, %v1141_v19  ;;  %vm1148_vm12 = vweird.f32 %v1647_v23  ;;  %v1081_v39 = vmul.f32 %v1079_v38, %v1074_v21 }
0x10b5   :  { %vm1149_vm14 = vmor %vm1147_vm13, %vm1148_vm12 }
0x10b6   :  { %v1144_v25 = vsub.f32 1.0, %v1143_v24 }
0x10b8   :  { %v1145_v26 = vmul.f32 %v1647_v23, %v1144_v25 }
0x10ba   :  { %v1146_v27 = vadd.f32 %v1647_v23, %v1145_v26 }
0x10bc   :  { %v1150_v30 = vsel %vm1149_vm14, %v1647_v23, %v1146_v27 }
0x10bd   :  { %v1155_v33 = vsel %vm1152_vm15, %v1154_v31, %v1150_v30 }
0x10be   :  { %v1162_v49 = vmul.f32 %v1160_v48, %v1155_v33 }
0x10f2   :  { %v1084_v20 = vpop.permute.xlu2 %1083 }
0x10f3   :  { %v1086_v22 = vmul.f32 %v1084_v20, %v1074_v21 }
0x10f5   :  { %1088 = vrot.lane.b32.xlu2 %v1086_v22, %s1880_s13 }
0x1112   :  { %v1165_v32 = vpop.permute.xlu0 %1164 }
0x1113   :  { %v1167_v37 = vmul.f32 %v1165_v32, %v1155_v33 }
0x1115   :  { %1169 = vrot.lane.b32.xlu2 %v1167_v37, %s1880_s13 }
0x114f   :  { %v1089_v40 = vpop.permute.xlu2 %1088 }
0x1150   :  { %v1091_v41 = vadd.f32 %v1089_v40, %v1081_v39 }
0x1152   :  { %1648 = vtanh.f32 %v1091_v41 }
0x1158   :  { %v1649_v42 = vpop.eup %1648 }
0x1159   :  { %1094 = vrot.lane.b32.xlu0 %v1649_v42, %s1880_s13 }
0x116f   :  { %v1170_v50 = vpop.permute.xlu2 %1169 }
0x1170   :  { %v1172_v51 = vadd.f32 %v1170_v50, %v1162_v49 }
0x1172   :  { %1650 = vtanh.f32 %v1172_v51 }
0x1178   :  { %v1651_v53 = vpop.eup %1650 }
0x1179   :  { %1175 = vrot.lane.b32.xlu2 %v1651_v53, %s1880_s13 }
0x1181   :  { %1104 = vrot.lane.b32.xlu2 %v1091_v41, %s1888_s2 }
0x11cb   :  { %v1095_v54 = vpop.permute.xlu0 %1094 }
0x11cc   :  { %v1097_v55 = vmul.f32 %v1095_v54, %v1074_v21 }
0x11ce   :  { %1099 = vrot.lane.b32.xlu1 %v1097_v55, %s1889_s4 }
0x11d3   :  { %v1176_v56 = vpop.permute.xlu2 %1175 }
0x11d4   :  { %v1178_v57 = vmul.f32 %v1176_v56, %v1155_v33 }
0x11d6   :  { %1180 = vrot.lane.b32.xlu0 %v1178_v57, %s1889_s4 }
0x11db   :  { %v1105_v58 = vpop.permute.xlu2 %1104 }
0x11dc   :  { %1107 = vst.msk [vmem:[#allocation3 + $0x2] sm:$0x3] %vm112_vm0, %v1105_v58 }
0x11e3   :  { %v1218_v59 = vld [vmem:[#allocation3 + $0x2] sm:$0x3] }
0x11e4   :  { %1240 = vrot.lane.b32.xlu2 %v1218_v59, %s1880_s13 }
0x123e   :  { %v1241_v33 = vpop.permute.xlu2 %1240 }
0x1240   :  { %v1100_v60 = vpop.permute.xlu1 %1099 }
0x1241   :  { %1102 = vst.msk [vmem:[#allocation2 + $0x2] sm:$0x3] %vm112_vm0, %v1100_v60 }
0x1242   :  { %1109 = vst.msk [vmem:[#allocation13 + $0xa] sm:$0x3] %vm112_vm0, %v1100_v60 }
0x1248   :  { %v1181_v61 = vpop.permute.xlu0 %1180  ;;  %v1189_v62 = vld [vmem:[#allocation2 + $0x2] sm:$0x3] }
0x1249   :  { %1183 = vst.msk [vmem:[#allocation2] sm:$0x3] %vm112_vm0, %v1181_v61  ;;  %1191 = vrot.lane.b32.xlu1 %v1189_v62, %s1880_s13 }
0x1250   :  { %v1274_v63 = vld [vmem:[#allocation2] sm:$0x3] }
0x1251   :  { %1529 = vmatmul.msk.f32.vlgmr.msra.gmra.mxu0 %vm134_vm1, %v1274_v63  ;;  %1185 = vrot.lane.b32.xlu1 %v1172_v51, %s1888_s2 }
0x12bb   :  { %v1192_v2 = vpop.permute.xlu1 %1191 }
0x12bc   :  { %v1194_v5 = vsel %vm134_vm1, %v1181_v61, %v1192_v2 }
0x12bd   :  { %1527 = vmatmul.msk.f32.vlgmr.msrb.gmra.mxu2 %vm222_vm6, %v1194_v5 }
0x12c3   :  { %v1186_v6 = vpop.permute.xlu1 %1185 }
0x12c4   :  { %1188 = vst.msk [vmem:[#allocation3] sm:$0x3] %vm112_vm0, %v1186_v6 }
0x12cb   :  { %v1299_v7 = vld [vmem:[#allocation3] sm:$0x3] }
0x12cc   :  { %1321 = vrot.lane.b32.xlu2 %v1299_v7, %s1880_s13 }
0x12ce   :  { %v1295_v9 = vpop.f32.mrf.mxu0 }
0x12cf   :  { %v1298_v10 = vadd.f32 %v1295_v9, %v1273_v8 }
0x12d1   :  { %1652 = vtanh.f32 %v1298_v10  ;;  %v1530_v4 = vmul.f32 -1.442695, %v1298_v10 }
0x12d7   :  { %v1653_v12 = vpop.eup %1652 }
0x12d8   :  { %1326 = vrot.lane.b32.xlu1 %v1653_v12, %s1880_s13 }
0x1326   :  { %v1322_v40 = vpop.permute.xlu2 %1321 }
0x1340   :  { %v1215_v0 = vpop.f32.mrf.mxu2 }
0x1341   :  { %v1216_v13 = vadd.f32 %v2219_v11, %v1215_v0 }
0x1343   :  { %1654 = vtanh.f32 %v1216_v13  ;;  %v1528_v3 = vmul.f32 -1.442695, %v1216_v13 }
0x1345   :  { %1656 = vpow2.f32 %v1528_v3 }
0x1346   :  { %1658 = vpow2.f32 %v1530_v4 }
0x1349   :  { %v1655_v1 = vpop.eup %1654 }
0x134a   :  { %1245 = vrot.lane.b32.xlu0 %v1655_v1, %s1880_s13  ;;  %v1327_v30 = vpop.permute.xlu1 %1326 }
0x134b   :  { %v1657_v34 = vpop.eup %1656 }
0x134c   :  { %v1222_v35 = vadd.f32 1.0, %v1657_v34  ;;  %v1659_v36 = vpop.eup %1658 }
0x134d   :  { %v1303_v14 = vadd.f32 1.0, %v1659_v36 }
0x134e   :  { %1660 = vrcp.f32 %v1222_v35  ;;  %v1234_v18 = vand.u32 2147483648, %v1222_v35  ;;  %vm1228_vm3 = vweird.f32 %v1222_v35  ;;  %v1232_v52 = vand.u32 2147483647, %v1222_v35 }
0x134f   :  { %1662 = vrcp.f32 %v1303_v14  ;;  %v1315_v26 = vand.u32 2147483648, %v1303_v14  ;;  %vm1309_vm8 = vweird.f32 %v1303_v14  ;;  %v1313_v27 = vand.u32 2147483647, %v1303_v14 }
0x1350   :  { %v1235_v21 = vor.u32 1.1754944e-38, %v1234_v18  ;;  %vm1233_vm5 = vcmp.eq.f32.partialorder %v1232_v52, 8.507059e+37 }
0x1351   :  { %v1316_v29 = vor.u32 1.1754944e-38, %v1315_v26  ;;  %vm1314_vm10 = vcmp.eq.f32.partialorder %v1313_v27, 8.507059e+37 }
0x1354   :  { %v1661_v43 = vpop.eup %1660 }
0x1355   :  { %v1224_v44 = vmul.f32 %v1661_v43, %v1222_v35  ;;  %v1663_v46 = vpop.eup %1662  ;;  %vm1229_vm2 = vweird.f32 %v1661_v43 }
0x1356   :  { %v1305_v15 = vmul.f32 %v1663_v46, %v1303_v14  ;;  %vm1230_vm4 = vmor %vm1228_vm3, %vm1229_vm2  ;;  %vm1310_vm7 = vweird.f32 %v1663_v46 }
0x1357   :  { %v1225_v45 = vsub.f32 1.0, %v1224_v44  ;;  %vm1311_vm9 = vmor %vm1309_vm8, %vm1310_vm7 }
0x1358   :  { %v1306_v47 = vsub.f32 1.0, %v1305_v15 }
0x1359   :  { %v1226_v16 = vmul.f32 %v1661_v43, %v1225_v45 }
0x135a   :  { %v1307_v19 = vmul.f32 %v1663_v46, %v1306_v47 }
0x135b   :  { %v1227_v17 = vadd.f32 %v1661_v43, %v1226_v16 }
0x135c   :  { %v1308_v24 = vadd.f32 %v1663_v46, %v1307_v19 }
0x135d   :  { %v1231_v20 = vsel %vm1230_vm4, %v1661_v43, %v1227_v17 }
0x135e   :  { %v1236_v23 = vsel %vm1233_vm5, %v1235_v21, %v1231_v20  ;;  %v1312_v28 = vsel %vm1311_vm9, %v1663_v46, %v1308_v24 }
0x135f   :  { %v1317_v31 = vsel %vm1314_vm10, %v1316_v29, %v1312_v28  ;;  %v1243_v37 = vmul.f32 %v1241_v33, %v1236_v23 }
0x1360   :  { %v1329_v32 = vmul.f32 %v1327_v30, %v1317_v31  ;;  %v1324_v41 = vmul.f32 %v1322_v40, %v1317_v31 }
0x13bc   :  { %v1246_v22 = vpop.permute.xlu0 %1245 }
0x13bd   :  { %v1248_v25 = vmul.f32 %v1246_v22, %v1236_v23 }
0x13bf   :  { %1250 = vrot.lane.b32.xlu0 %v1248_v25, %s1880_s13 }
0x13c7   :  { %1331 = vrot.lane.b32.xlu0 %v1329_v32, %s1880_s13 }
0x1431   :  { %v1251_v38 = vpop.permute.xlu0 %1250 }
0x1432   :  { %v1253_v39 = vadd.f32 %v1251_v38, %v1243_v37 }
0x1434   :  { %1664 = vtanh.f32 %v1253_v39 }
0x1439   :  { %v1332_v42 = vpop.permute.xlu0 %1331 }
0x143a   :  { %v1665_v48 = vpop.eup %1664  ;;  %v1334_v49 = vadd.f32 %v1332_v42, %v1324_v41 }
0x143b   :  { %1256 = vrot.lane.b32.xlu1 %v1665_v48, %s1880_s13 }
0x143c   :  { %1666 = vtanh.f32 %v1334_v49 }
0x1442   :  { %v1667_v50 = vpop.eup %1666 }
0x1443   :  { %1337 = vrot.lane.b32.xlu0 %v1667_v50, %s1880_s13 }
0x144b   :  { %1266 = vrot.lane.b32.xlu0 %v1253_v39, %s1888_s2 }
0x14ad   :  { %v1257_v51 = vpop.permute.xlu1 %1256 }
0x14ae   :  { %v1259_v53 = vmul.f32 %v1257_v51, %v1236_v23 }
0x14b0   :  { %1261 = vrot.lane.b32.xlu2 %v1259_v53, %s1889_s4 }
0x14b5   :  { %v1338_v54 = vpop.permute.xlu0 %1337 }
0x14b6   :  { %v1340_v55 = vmul.f32 %v1338_v54, %v1317_v31 }
0x14b8   :  { %1342 = vrot.lane.b32.xlu1 %v1340_v55, %s1889_s4 }
0x14bd   :  { %v1267_v56 = vpop.permute.xlu0 %1266 }
0x14be   :  { %1269 = vst.msk [vmem:[#allocation3 + $0x2] sm:$0x3] %vm112_vm0, %v1267_v56 }
0x14c5   :  { %v1380_v59 = vld [vmem:[#allocation3 + $0x2] sm:$0x3] }
0x150a   :  { %v1262_v57 = vpop.permute.xlu2 %1261 }
0x150b   :  { %1264 = vst.msk [vmem:[#allocation2 + $0x2] sm:$0x3] %vm112_vm0, %v1262_v57 }
0x150c   :  { %1271 = vst.msk [vmem:[#allocation13 + $0xc] sm:$0x3] %vm112_vm0, %v1262_v57 }
0x1512   :  { %v1351_v58 = vld [vmem:[#allocation2 + $0x2] sm:$0x3] }
0x1513   :  { %1353 = vrot.lane.b32.xlu2 %v1351_v58, %s1880_s13 }
0x151b   :  { %1402 = vrot.lane.b32.xlu2 %v1380_v59, %s1880_s13 }
0x152a   :  { %v1343_v60 = vpop.permute.xlu1 %1342 }
0x152b   :  { %1345 = vst.msk [vmem:[#allocation2] sm:$0x3] %vm112_vm0, %v1343_v60 }
0x1532   :  { %v1437_v61 = vld [vmem:[#allocation2] sm:$0x3] }
0x1533   :  { %1439 = vst.msk [vmem:[#allocation14] sm:$0x3] %vm112_vm0, %v1437_v61 }
0x156d   :  { %v1354_v62 = vpop.permute.xlu2 %1353 }
0x156e   :  { %v1356_v63 = vsel %vm134_vm1, %v1343_v60, %v1354_v62 }
0x156f   :  { %1531 = vmatmul.msk.f32.vlgmr.msra.gmra.mxu1 %vm222_vm6, %v1356_v63 }
0x1575   :  { %v1403_v43 = vpop.permute.xlu2 %1402 }
0x15ec   :  { %v1377_v2 = vpop.f32.mrf.mxu1 }
0x15ed   :  { %v1378_v5 = vadd.f32 %v2219_v11, %v1377_v2 }
0x15ef   :  { %1668 = vtanh.f32 %v1378_v5  ;;  %v1532_v7 = vmul.f32 -1.442695, %v1378_v5 }
0x15f1   :  { %1670 = vpow2.f32 %v1532_v7 }
0x15f5   :  { %v1669_v6 = vpop.eup %1668 }
0x15f6   :  { %1407 = vrot.lane.b32.xlu1 %v1669_v6, %s1880_s13 }
0x15f7   :  { %v1671_v8 = vpop.eup %1670 }
0x15f8   :  { %v1384_v9 = vadd.f32 1.0, %v1671_v8 }
0x15fa   :  { %1672 = vrcp.f32 %v1384_v9  ;;  %v1396_v3 = vand.u32 2147483648, %v1384_v9  ;;  %vm1390_vm6 = vweird.f32 %v1384_v9  ;;  %v1394_v4 = vand.u32 2147483647, %v1384_v9 }
0x15fc   :  { %v1397_v34 = vor.u32 1.1754944e-38, %v1396_v3  ;;  %vm1395_vm12 = vcmp.eq.f32.partialorder %v1394_v4, 8.507059e+37 }
0x1600   :  { %v1673_v10 = vpop.eup %1672 }
0x1601   :  { %v1386_v12 = vmul.f32 %v1673_v10, %v1384_v9  ;;  %vm1391_vm1 = vweird.f32 %v1673_v10 }
0x1602   :  { %vm1392_vm11 = vmor %vm1390_vm6, %vm1391_vm1 }
0x1603   :  { %v1387_v0 = vsub.f32 1.0, %v1386_v12 }
0x1605   :  { %v1388_v13 = vmul.f32 %v1673_v10, %v1387_v0 }
0x1607   :  { %v1389_v1 = vadd.f32 %v1673_v10, %v1388_v13 }
0x1609   :  { %v1393_v11 = vsel %vm1392_vm11, %v1673_v10, %v1389_v1 }
0x160a   :  { %v1398_v36 = vsel %vm1395_vm12, %v1397_v34, %v1393_v11 }
0x160b   :  { %v1405_v44 = vmul.f32 %v1403_v43, %v1398_v36 }
0x1668   :  { %v1408_v35 = vpop.permute.xlu1 %1407 }
0x1669   :  { %v1410_v14 = vmul.f32 %v1408_v35, %v1398_v36 }
0x166b   :  { %1412 = vrot.lane.b32.xlu0 %v1410_v14, %s1880_s13 }
0x1673   :  { %1347 = vrot.lane.b32.xlu0 %v1334_v49, %s1888_s2 }
0x16dd   :  { %v1413_v45 = vpop.permute.xlu0 %1412 }
0x16de   :  { %v1415_v46 = vadd.f32 %v1413_v45, %v1405_v44 }
0x16e0   :  { %1674 = vtanh.f32 %v1415_v46 }
0x16e5   :  { %v1348_v15 = vpop.permute.xlu0 %1347 }
0x16e6   :  { %v1675_v16 = vpop.eup %1674  ;;  %1350 = vst.msk [vmem:[#allocation3] sm:$0x3] %vm112_vm0, %v1348_v15 }
0x16e7   :  { %1418 = vrot.lane.b32.xlu1 %v1675_v16, %s1880_s13 }
0x16ed   :  { %v1441_v47 = vld [vmem:[#allocation3] sm:$0x3] }
0x16ee   :  { %1443 = vst.msk [vmem:[#allocation16] sm:$0x3] %vm112_vm0, %v1441_v47 }
0x16ef   :  { %1428 = vrot.lane.b32.xlu1 %v1415_v46, %s1888_s2 }
0x1759   :  { %v1419_v17 = vpop.permute.xlu1 %1418 }
0x175a   :  { %v1421_v18 = vmul.f32 %v1419_v17, %v1398_v36 }
0x175c   :  { %1423 = vrot.lane.b32.xlu2 %v1421_v18, %s1889_s4 }
0x1761   :  { %v1429_v52 = vpop.permute.xlu1 %1428 }
0x1762   :  { %1431 = vst.msk [vmem:[#allocation3 + $0x2] sm:$0x3] %vm112_vm0, %v1429_v52 }
0x1769   :  { %v1442_v19 = vld [vmem:[#allocation3 + $0x2] sm:$0x3] }
0x176a   :  { %1444 = vst.msk [vmem:[#allocation16 + $0x2] sm:$0x3] %vm112_vm0, %v1442_v19 }
0x17b6   :  { %v1424_v20 = vpop.permute.xlu2 %1423 }
0x17b7   :  { %1426 = vst.msk [vmem:[#allocation2 + $0x2] sm:$0x3] %vm112_vm0, %v1424_v20 }
0x17b8   :  { %1433 = vst.msk [vmem:[#allocation13 + $0xe] sm:$0x3] %vm112_vm0, %v1424_v20 }
0x17b9   :  { %1457 = dma.vmem_to_hbm [thread:$0]  %s1450_s15, 256, %s1452_s1, [#allocation6], %s1880_s13, %s1880_s13, %s1881_s14  }
0x17be   :  { %v1438_v21 = vld [vmem:[#allocation2 + $0x2] sm:$0x3] }
0x17bf   :  { %1440 = vst.msk [vmem:[#allocation14 + $0x2] sm:$0x3] %vm112_vm0, %v1438_v21 }
0x17c0   :  { %1470 = dma.vmem_to_hbm [thread:$0]  %s1463_s19, 64, %s1465_s3, [#allocation15], %s1880_s13, %s1880_s13, %s1881_s14  }
0x17c1   :  { %1483 = dma.vmem_to_hbm [thread:$0]  %s1476_s23, 64, %s1478_s25, [#allocation15], %s1880_s13, %s1880_s13, %s1881_s14  }
0x17c2   :  { %1875 = dma.done.wait [#allocation6], 256  }
0x17c3   :  { %1876 = vsyncadd [#allocation6], 4294967040 }
0x17c4   :  { %1877 = dma.done.wait [#allocation15], 128  }
0x17c5   :  { %1878 = vsyncadd [#allocation15], 4294967168 }
0x17c6   :  { %1496 = vsyncpa [#allocation5], 1 }
0x17c7   :  { %1497 = vsyncpa [#allocation8], 1 }
0x17c8   :  { %1498 = vsyncpa [#allocation11], 1 }
0x17c9   :  { %1499 = vsyncpa [#allocation6], 1 }
0x17ca   :  { %1500 = vsyncpa [#allocation15], 1 }

</bundles_post_ra>
